<compile_context>
chip_gen: v7x
topology: tpu7x:2x2x1
jax: 0.10.0
libtpu: 0.0.40
codegen_flags: <defaults>
</compile_context>

<pallas_src>
import functools

import jax
import jax.numpy as jnp
from jax.experimental import pallas as pl
from jax.experimental.pallas import tpu as pltpu

_LANE = 128                      # lane width == Cout tile (also v5e MXU width)
_ROW_TILE_TARGET = 8             # target output rows per grid step
_VMEM_LIMIT = 48 * 1024 * 1024   # headroom below v7x's 64 MiB physical VMEM


# ------------------------------ small helpers -------------------------------

def _round_up(x, m):
    return (x + m - 1) // m * m


def _out_dim(n, k, stride, padding):
    return (n + 2 * padding - k) // stride + 1


def _pick_row_tile(n, target, multiple=1):
    """Largest divisor of n that is <= target and a multiple of `multiple`."""
    for t in range(min(target, n), 0, -1):
        if n % t == 0 and t % multiple == 0:
            return t
    return n


def _to_nhwc(x):
    return jnp.transpose(x, (0, 2, 3, 1))


def _to_nchw(x):
    return jnp.transpose(x, (0, 3, 1, 2))


def _prep_input(x_nhwc, padding, cin_pad):
    """Zero-pad spatially (conv padding) + channels (lane alignment), cast bf16."""
    N, H, W, C = x_nhwc.shape
    x = jnp.pad(x_nhwc, ((0, 0), (padding, padding), (padding, padding),
                         (0, cin_pad - C)))
    return x.astype(jnp.bfloat16)


def _prep_weight(w_oihw, b, cin_pad, cout_pad):
    """OIHW -> flattened HWIO (KH*KW*Cin_pad, Cout_pad) bf16; bias (1, Cout_pad) f32."""
    O, I, KH, KW = w_oihw.shape
    w = jnp.pad(w_oihw, ((0, cout_pad - O), (0, cin_pad - I), (0, 0), (0, 0)))
    w = jnp.transpose(w, (2, 3, 1, 0)).reshape(KH * KW * cin_pad, cout_pad)
    bp = jnp.pad(b, (0, cout_pad - O)).reshape(1, cout_pad)
    return w.astype(jnp.bfloat16), bp.astype(jnp.float32)


# ------------------------------ kernel bodies --------------------------------

def _conv_band(x_ref, w_ref, b_ref, *, r0, rows, cols, KH, KW, stride):
    """Conv of `rows` output rows (starting at output row r0) as ONE MXU matmul.

    x_ref: (1, Hp, Wp, Cin_pad)  zero-padded NHWC input (bf16), whole image.
    w_ref: (KH*KW*Cin_pad, TC)   tap-folded HWIO weight tile (bf16).
    b_ref: (1, TC)               f32 bias tile.
    returns (rows, cols, TC) float32.
    """
    cin = x_ref.shape[-1]
    band = stride * (rows - 1) + KH            # input rows needed for this tile
    x = x_ref[0, pl.ds(r0 * stride, band), :, :]   # (band, Wp, Cin_pad) bf16
    r_span = stride * (rows - 1) + 1
    c_span = stride * (cols - 1) + 1
    pieces = []
    for kh in range(KH):
        for kw in range(KW):
            sl = x[kh:kh + r_span:stride, kw:kw + c_span:stride, :]
            pieces.append(sl.reshape(rows * cols, cin))
    lhs = jnp.concatenate(pieces, axis=-1)     # (rows*cols, KH*KW*Cin_pad)
    acc = jnp.dot(lhs, w_ref[...], preferred_element_type=jnp.float32)
    acc = acc + b_ref[...]                     # f32 bias epilogue
    return acc.reshape(rows, cols, -1)


def _conv_kernel(x_ref, w_ref, b_ref, o_ref, *, KH, KW, stride, rows, cols):
    r0 = pl.program_id(2) * rows
    acc = _conv_band(x_ref, w_ref, b_ref, r0=r0, rows=rows, cols=cols,
                     KH=KH, KW=KW, stride=stride)
    o_ref[0] = acc.astype(o_ref.dtype)


def _oct_high_kernel(xh_ref, wh_ref, bh_ref, xl_ref, wl_ref, bl_ref, o_ref, *,
                     KH, KW, stride, th, wo_h, wo_l):
    """out_h tile = conv_h2h(x_h) + nearest_upsample_x2(conv_l2h(x_l))."""
    r_hi = pl.program_id(2) * th
    r_lo = pl.program_id(2) * (th // 2)
    hi = _conv_band(xh_ref, wh_ref, bh_ref, r0=r_hi, rows=th, cols=wo_h,
                    KH=KH, KW=KW, stride=stride)
    lo = _conv_band(xl_ref, wl_ref, bl_ref, r0=r_lo, rows=th // 2, cols=wo_l,
                    KH=KH, KW=KW, stride=stride)
    tc = lo.shape[-1]
    up = jnp.broadcast_to(lo[:, None, :, None, :],
                          (th // 2, 2, wo_l, 2, tc)).reshape(th, wo_h, tc)
    o_ref[0] = (hi + up).astype(o_ref.dtype)


def _oct_low_kernel(xh_ref, wh_ref, bh_ref, xl_ref, wl_ref, bl_ref, o_ref, *,
                    KH, KW, stride, tl, wo_h, wo_l):
    """out_l tile = avg_pool2x2(conv_h2l(x_h)) + conv_l2l(x_l)."""
    r_lo = pl.program_id(2) * tl
    r_hi = 2 * r_lo
    hi = _conv_band(xh_ref, wh_ref, bh_ref, r0=r_hi, rows=2 * tl, cols=wo_h,
                    KH=KH, KW=KW, stride=stride)
    lo = _conv_band(xl_ref, wl_ref, bl_ref, r0=r_lo, rows=tl, cols=wo_l,
                    KH=KH, KW=KW, stride=stride)
    tc = lo.shape[-1]
    pooled = hi.reshape(tl, 2, wo_l, 2, tc).mean(axis=(1, 3))
    o_ref[0] = (pooled + lo).astype(o_ref.dtype)


def _avg_pool2x2_kernel(x_ref, o_ref):
    x = x_ref[0]
    Hl, Wl, C = o_ref.shape[1:]
    o_ref[0] = x.reshape(Hl, 2, Wl, 2, C).mean(axis=(1, 3)).astype(o_ref.dtype)


# ------------------------------ pallas wrappers ------------------------------

def conv2d_nhwc(x, w_oihw, b, stride, padding):
    """Plain conv; NHWC float32 in, NHWC float32 out (unpadded channels)."""
    N, H, W, Cin = x.shape
    Cout, _, KH, KW = w_oihw.shape
    cin_p = _round_up(Cin, _LANE)
    cout_p = _round_up(Cout, _LANE)
    Hp, Wp = H + 2 * padding, W + 2 * padding
    Ho = _out_dim(H, KH, stride, padding)
    Wo = _out_dim(W, KW, stride, padding)
    xp = _prep_input(x, padding, cin_p)
    wf, bf = _prep_weight(w_oihw, b, cin_p, cout_p)
    TR = _pick_row_tile(Ho, _ROW_TILE_TARGET)
    TC = min(cout_p, _LANE)
    kern = functools.partial(_conv_kernel, KH=KH, KW=KW, stride=stride,
                             rows=TR, cols=Wo)
    out = pl.pallas_call(
        kern,
        out_shape=jax.ShapeDtypeStruct((N, Ho, Wo, cout_p), jnp.float32),
        grid=(N, cout_p // TC, Ho // TR),
        in_specs=[
            pl.BlockSpec((1, Hp, Wp, cin_p), lambda n, c, r: (n, 0, 0, 0)),
            pl.BlockSpec((KH * KW * cin_p, TC), lambda n, c, r: (0, c)),
            pl.BlockSpec((1, TC), lambda n, c, r: (0, c)),
        ],
        out_specs=pl.BlockSpec((1, TR, Wo, TC), lambda n, c, r: (n, r, 0, c)),
        compiler_params=pltpu.CompilerParams(
            dimension_semantics=("parallel", "parallel", "parallel"),
            vmem_limit_bytes=_VMEM_LIMIT),
    )(xp, wf, bf)
    return out[..., :Cout]


def avg_pool2x2_nhwc(x):
    N, H, W, C = x.shape
    return pl.pallas_call(
        _avg_pool2x2_kernel,
        out_shape=jax.ShapeDtypeStruct((N, H // 2, W // 2, C), x.dtype),
        grid=(N,),
        in_specs=[pl.BlockSpec((1, H, W, C), lambda n: (n, 0, 0, 0))],
        out_specs=pl.BlockSpec((1, H // 2, W // 2, C), lambda n: (n, 0, 0, 0)),
        compiler_params=pltpu.CompilerParams(dimension_semantics=("parallel",)),
    )(x)


def _fused_call(mode, xh_p, xl_p, wf_h, bf_h, wf_l, bf_l, *,
                KH, KW, stride, Ho_h, Wo_h, Ho_l, Wo_l, cout_pad):
    """One fused pallas_call producing out_h ("high") or out_l ("low")."""
    N = xh_p.shape[0]
    _, Hp_h, Wp_h, cin_hp = xh_p.shape
    _, Hp_l, Wp_l, cin_lp = xl_p.shape
    TC = min(cout_pad, _LANE)
    if mode == "high":
        TH = _pick_row_tile(Ho_h, _ROW_TILE_TARGET, multiple=2)
        kern = functools.partial(_oct_high_kernel, KH=KH, KW=KW, stride=stride,
                                 th=TH, wo_h=Wo_h, wo_l=Wo_l)
        n_rt = Ho_h // TH
        oshape = (N, Ho_h, Wo_h, cout_pad)
        oblock = (1, TH, Wo_h, TC)
    else:
        TL = _pick_row_tile(Ho_l, max(_ROW_TILE_TARGET // 2, 1))
        kern = functools.partial(_oct_low_kernel, KH=KH, KW=KW, stride=stride,
                                 tl=TL, wo_h=Wo_h, wo_l=Wo_l)
        n_rt = Ho_l // TL
        oshape = (N, Ho_l, Wo_l, cout_pad)
        oblock = (1, TL, Wo_l, TC)
    return pl.pallas_call(
        kern,
        out_shape=jax.ShapeDtypeStruct(oshape, jnp.float32),
        grid=(N, cout_pad // TC, n_rt),
        in_specs=[
            pl.BlockSpec((1, Hp_h, Wp_h, cin_hp), lambda n, c, r: (n, 0, 0, 0)),
            pl.BlockSpec((KH * KW * cin_hp, TC), lambda n, c, r: (0, c)),
            pl.BlockSpec((1, TC), lambda n, c, r: (0, c)),
            pl.BlockSpec((1, Hp_l, Wp_l, cin_lp), lambda n, c, r: (n, 0, 0, 0)),
            pl.BlockSpec((KH * KW * cin_lp, TC), lambda n, c, r: (0, c)),
            pl.BlockSpec((1, TC), lambda n, c, r: (0, c)),
        ],
        out_specs=pl.BlockSpec(oblock, lambda n, c, r: (n, r, 0, c)),
        compiler_params=pltpu.CompilerParams(
            dimension_semantics=("parallel", "parallel", "parallel"),
            vmem_limit_bytes=_VMEM_LIMIT),
    )(xh_p, wf_h, bf_h, xl_p, wf_l, bf_l)


def _oct_geometry(xh, xl, KH, KW, stride, padding):
    N, Hh, Wh, Cin_h = xh.shape
    _, Hl, Wl, Cin_l = xl.shape
    Ho_h, Wo_h = _out_dim(Hh, KH, stride, padding), _out_dim(Wh, KW, stride, padding)
    Ho_l, Wo_l = _out_dim(Hl, KH, stride, padding), _out_dim(Wl, KW, stride, padding)
    if Ho_h != 2 * Ho_l or Wo_h != 2 * Wo_l:
        # TODO(synk): general F.interpolate target sizes not implemented; only
        # the standard 2x octave ratio used by OctConv is supported.
        raise NotImplementedError("high-frequency output must be exactly 2x "
                                  "the low-frequency output")
    return (Cin_h, Cin_l, Ho_h, Wo_h, Ho_l, Wo_l)


def oct_conv_dual(xh, xl, H2H, H2L, L2H, L2L, stride, padding):
    """Both fused outputs; xh/xl are NHWC float32, returns NHWC float32."""
    KH, KW = H2H[0].shape[2], H2H[0].shape[3]
    Cin_h, Cin_l, Ho_h, Wo_h, Ho_l, Wo_l = _oct_geometry(
        xh, xl, KH, KW, stride, padding)
    cout_hf, cout_lf = H2H[0].shape[0], H2L[0].shape[0]
    cin_hp, cin_lp = _round_up(Cin_h, _LANE), _round_up(Cin_l, _LANE)
    cout_hp, cout_lp = _round_up(cout_hf, _LANE), _round_up(cout_lf, _LANE)

    xh_p = _prep_input(xh, padding, cin_hp)     # shared between the two calls
    xl_p = _prep_input(xl, padding, cin_lp)
    w_h2h, b_h2h = _prep_weight(*H2H, cin_hp, cout_hp)
    w_l2h, b_l2h = _prep_weight(*L2H, cin_lp, cout_hp)
    w_h2l, b_h2l = _prep_weight(*H2L, cin_hp, cout_lp)
    w_l2l, b_l2l = _prep_weight(*L2L, cin_lp, cout_lp)

    out_h = _fused_call("high", xh_p, xl_p, w_h2h, b_h2h, w_l2h, b_l2h,
                        KH=KH, KW=KW, stride=stride, Ho_h=Ho_h, Wo_h=Wo_h,
                        Ho_l=Ho_l, Wo_l=Wo_l, cout_pad=cout_hp)
    out_l = _fused_call("low", xh_p, xl_p, w_h2l, b_h2l, w_l2l, b_l2l,
                        KH=KH, KW=KW, stride=stride, Ho_h=Ho_h, Wo_h=Wo_h,
                        Ho_l=Ho_l, Wo_l=Wo_l, cout_pad=cout_lp)
    return out_h[..., :cout_hf], out_l[..., :cout_lf]


def oct_conv_high(xh, xl, H2H, L2H, stride, padding):
    """Fused out_h only (alpha_out == 0 branch)."""
    KH, KW = H2H[0].shape[2], H2H[0].shape[3]
    Cin_h, Cin_l, Ho_h, Wo_h, Ho_l, Wo_l = _oct_geometry(
        xh, xl, KH, KW, stride, padding)
    cout_hf = H2H[0].shape[0]
    cin_hp, cin_lp = _round_up(Cin_h, _LANE), _round_up(Cin_l, _LANE)
    cout_hp = _round_up(cout_hf, _LANE)
    xh_p = _prep_input(xh, padding, cin_hp)
    xl_p = _prep_input(xl, padding, cin_lp)
    w_h2h, b_h2h = _prep_weight(*H2H, cin_hp, cout_hp)
    w_l2h, b_l2h = _prep_weight(*L2H, cin_lp, cout_hp)
    out_h = _fused_call("high", xh_p, xl_p, w_h2h, b_h2h, w_l2h, b_l2h,
                        KH=KH, KW=KW, stride=stride, Ho_h=Ho_h, Wo_h=Wo_h,
                        Ho_l=Ho_l, Wo_l=Wo_l, cout_pad=cout_hp)
    return out_h[..., :cout_hf]


# -------------------------------- OctConv2d ----------------------------------

class OctConv2dPallas:
    """Pallas port of researchlib _OctConv2d forward (NCHW in / NCHW out)."""

    def __init__(self, ch_in, ch_out, kernel_size, stride=1, padding=0,
                 alphas=(0.5, 0.5), key=None):
        self.alpha_in, self.alpha_out = alphas
        assert 0 <= self.alpha_in <= 1 and 0 <= self.alpha_out <= 1
        self.stride, self.padding, self.k = stride, padding, kernel_size
        self.ch_in_hf = int((1 - self.alpha_in) * ch_in)
        self.ch_in_lf = ch_in - self.ch_in_hf
        self.ch_out_hf = int((1 - self.alpha_out) * ch_out)
        self.ch_out_lf = ch_out - self.ch_out_hf
        if key is None:
            key = jax.random.PRNGKey(0)
        keys = jax.random.split(key, 8)

        def make(cin, cout, kw_, kb_):
            if cin <= 0 or cout <= 0:
                return None
            fan_in = cin * kernel_size * kernel_size
            w = jax.random.normal(kw_, (cout, cin, kernel_size, kernel_size),
                                  jnp.float32) / jnp.sqrt(float(fan_in))
            b = jax.random.normal(kb_, (cout,), jnp.float32) * 0.01
            return (w, b)

        self.H2H = make(self.ch_in_hf, self.ch_out_hf, keys[0], keys[1])
        self.H2L = make(self.ch_in_hf, self.ch_out_lf, keys[2], keys[3])
        self.L2H = make(self.ch_in_lf, self.ch_out_hf, keys[4], keys[5])
        self.L2L = make(self.ch_in_lf, self.ch_out_lf, keys[6], keys[7])

    def __call__(self, x):
        s, p = self.stride, self.padding
        if self.alpha_in == 0 and self.alpha_out == 0:
            out = conv2d_nhwc(_to_nhwc(x), *self.H2H, s, p)
            return _to_nchw(out)
        elif self.alpha_in == 0 and self.alpha_out != 0:
            xh = _to_nhwc(x)
            out_h = conv2d_nhwc(xh, *self.H2H, s, p)
            out_l = conv2d_nhwc(avg_pool2x2_nhwc(xh), *self.H2L, s, p)
            return _to_nchw(out_h), _to_nchw(out_l)
        elif self.alpha_in != 0 and self.alpha_out != 0:
            in_h, in_l = x
            out_h, out_l = oct_conv_dual(_to_nhwc(in_h), _to_nhwc(in_l),
                                         self.H2H, self.H2L, self.L2H,
                                         self.L2L, s, p)
            return _to_nchw(out_h), _to_nchw(out_l)
        else:
            in_h, in_l = x
            out_h = oct_conv_high(_to_nhwc(in_h), _to_nhwc(in_l),
                                  self.H2H, self.L2H, s, p)
            return _to_nchw(out_h)


# -------------------------------- Reference ----------------------------------

def _ref_conv(x, wb, stride, padding):
    """Same numerics as the kernels: bf16 operands, f32 MXU accumulation."""
    w, b = wb
    y = jax.lax.conv_general_dilated(
        x.astype(jnp.bfloat16), w.astype(jnp.bfloat16),
        (stride, stride), [(padding, padding), (padding, padding)],
        dimension_numbers=("NCHW", "OIHW", "NCHW"),
        preferred_element_type=jnp.float32)
    return y + b[None, :, None, None]


def _ref_pool(x):
    N, C, H, W = x.shape
    return x.reshape(N, C, H // 2, 2, W // 2, 2).mean(axis=(3, 5))


def _ref_up(x):
    return jnp.repeat(jnp.repeat(x, 2, axis=2), 2, axis=3)


# ---------------------------------- Main -------------------------------------

if __name__ == "__main__":
    key = jax.random.PRNGKey(0)
    k_h, k_l, k_p = jax.random.split(key, 3)

    N, ch_in, ch_out, H = 2, 4, 4, 16
    oct_conv = OctConv2dPallas(ch_in, ch_out, kernel_size=3, stride=1,
                               padding=1, alphas=(0.5, 0.5), key=k_p)

    in_h = jax.random.normal(k_h, (N, oct_conv.ch_in_hf, H, H), jnp.float32)
    in_l = jax.random.normal(k_l, (N, oct_conv.ch_in_lf, H // 2, H // 2),
                             jnp.float32)

    out_h, out_l = oct_conv((in_h, in_l))
    jax.block_until_ready((out_h, out_l))

    # pure-JAX reference for the (alpha_in != 0, alpha_out != 0) branch
    h2h = _ref_conv(in_h, oct_conv.H2H, 1, 1)
    h2l = _ref_pool(_ref_conv(in_h, oct_conv.H2L, 1, 1))
    l2h = _ref_up(_ref_conv(in_l, oct_conv.L2H, 1, 1))
    l2l = _ref_conv(in_l, oct_conv.L2L, 1, 1)
    ref_h = h2h + l2h
    ref_l = h2l + l2l

    assert out_h.shape == (N, oct_conv.ch_out_hf, H, H)
    assert out_l.shape == (N, oct_conv.ch_out_lf, H // 2, H // 2)
    assert jnp.allclose(out_h, ref_h, atol=2e-3, rtol=2e-3)
    assert jnp.allclose(out_l, ref_l, atol=2e-3, rtol=2e-3)

    print("KERNEL_OK")
</pallas_src>

<mosaic_0001>
module attributes {stable_mosaic.version = 11 : i64} {
  func.func @_oct_high_kernel(%arg0: i32, %arg1: i32, %arg2: i32, %arg3: memref<1x18x18x128xbf16, #tpu.memory_space<vmem>>, %arg4: memref<1152x128xbf16, #tpu.memory_space<vmem>>, %arg5: memref<1x128xf32, #tpu.memory_space<vmem>>, %arg6: memref<1x10x10x128xbf16, #tpu.memory_space<vmem>>, %arg7: memref<1152x128xbf16, #tpu.memory_space<vmem>>, %arg8: memref<1x128xf32, #tpu.memory_space<vmem>>, %arg9: memref<1x8x16x128xf32, #tpu.memory_space<vmem>>) attributes {dimension_semantics = [#tpu.dimension_semantics<parallel>, #tpu.dimension_semantics<parallel>, #tpu.dimension_semantics<parallel>], iteration_bounds = array<i64: 2, 1, 2>, scalar_prefetch = 0 : i64, scratch_operands = 0 : i64, tpu.core_type = #tpu.core_type<tc>, window_params = [{transform_indices = @transform_0, window_bounds = array<i64: 1, 18, 18, 128>}, {transform_indices = @transform_1, window_bounds = array<i64: 1152, 128>}, {transform_indices = @transform_2, window_bounds = array<i64: 1, 128>}, {transform_indices = @transform_3, window_bounds = array<i64: 1, 10, 10, 128>}, {transform_indices = @transform_4, window_bounds = array<i64: 1152, 128>}, {transform_indices = @transform_5, window_bounds = array<i64: 1, 128>}, {transform_indices = @transform_6, window_bounds = array<i64: 1, 8, 16, 128>}]} {
    %c8_i32 = arith.constant 8 : i32
    %0 = arith.muli %arg2, %c8_i32 : i32
    %c4_i32 = arith.constant 4 : i32
    %1 = arith.muli %arg2, %c4_i32 : i32
    %c1_i32 = arith.constant 1 : i32
    %2 = arith.muli %0, %c1_i32 : i32
    %c0 = arith.constant 0 : index
    %3 = arith.index_cast %2 : i32 to index
    %c0_0 = arith.constant 0 : index
    %c0_1 = arith.constant 0 : index
    %4 = vector.load %arg3[%c0, %3, %c0_0, %c0_1] : memref<1x18x18x128xbf16, #tpu.memory_space<vmem>>, vector<1x10x18x128xbf16>
    %5 = vector.shape_cast %4 : vector<1x10x18x128xbf16> to vector<10x18x128xbf16>
    %6 = vector.extract_strided_slice %5 {offsets = [0, 0, 0], sizes = [8, 16, 128], strides = [1, 1, 1]} : vector<10x18x128xbf16> to vector<8x16x128xbf16>
    %7 = vector.shape_cast %6 : vector<8x16x128xbf16> to vector<128x128xbf16>
    %8 = vector.extract_strided_slice %5 {offsets = [0, 1, 0], sizes = [8, 16, 128], strides = [1, 1, 1]} : vector<10x18x128xbf16> to vector<8x16x128xbf16>
    %9 = vector.shape_cast %8 : vector<8x16x128xbf16> to vector<128x128xbf16>
    %10 = vector.extract_strided_slice %5 {offsets = [0, 2, 0], sizes = [8, 16, 128], strides = [1, 1, 1]} : vector<10x18x128xbf16> to vector<8x16x128xbf16>
    %11 = vector.shape_cast %10 : vector<8x16x128xbf16> to vector<128x128xbf16>
    %12 = vector.extract_strided_slice %5 {offsets = [1, 0, 0], sizes = [8, 16, 128], strides = [1, 1, 1]} : vector<10x18x128xbf16> to vector<8x16x128xbf16>
    %13 = vector.shape_cast %12 : vector<8x16x128xbf16> to vector<128x128xbf16>
    %14 = vector.extract_strided_slice %5 {offsets = [1, 1, 0], sizes = [8, 16, 128], strides = [1, 1, 1]} : vector<10x18x128xbf16> to vector<8x16x128xbf16>
    %15 = vector.shape_cast %14 : vector<8x16x128xbf16> to vector<128x128xbf16>
    %16 = vector.extract_strided_slice %5 {offsets = [1, 2, 0], sizes = [8, 16, 128], strides = [1, 1, 1]} : vector<10x18x128xbf16> to vector<8x16x128xbf16>
    %17 = vector.shape_cast %16 : vector<8x16x128xbf16> to vector<128x128xbf16>
    %18 = vector.extract_strided_slice %5 {offsets = [2, 0, 0], sizes = [8, 16, 128], strides = [1, 1, 1]} : vector<10x18x128xbf16> to vector<8x16x128xbf16>
    %19 = vector.shape_cast %18 : vector<8x16x128xbf16> to vector<128x128xbf16>
    %20 = vector.extract_strided_slice %5 {offsets = [2, 1, 0], sizes = [8, 16, 128], strides = [1, 1, 1]} : vector<10x18x128xbf16> to vector<8x16x128xbf16>
    %21 = vector.shape_cast %20 : vector<8x16x128xbf16> to vector<128x128xbf16>
    %22 = vector.extract_strided_slice %5 {offsets = [2, 2, 0], sizes = [8, 16, 128], strides = [1, 1, 1]} : vector<10x18x128xbf16> to vector<8x16x128xbf16>
    %23 = vector.shape_cast %22 : vector<8x16x128xbf16> to vector<128x128xbf16>
    %24 = tpu.concatenate %7, %9, %11, %13, %15, %17, %19, %21, %23 in 1 : vector<128x128xbf16>, vector<128x128xbf16>, vector<128x128xbf16>, vector<128x128xbf16>, vector<128x128xbf16>, vector<128x128xbf16>, vector<128x128xbf16>, vector<128x128xbf16>, vector<128x128xbf16> -> vector<128x1152xbf16>
    %c0_2 = arith.constant 0 : index
    %c0_3 = arith.constant 0 : index
    %25 = vector.load %arg4[%c0_2, %c0_3] : memref<1152x128xbf16, #tpu.memory_space<vmem>>, vector<1152x128xbf16>
    %cst = arith.constant dense<0.000000e+00> : vector<128x128xf32>
    %26 = tpu.matmul %24, %25, %cst {dimension_numbers = #tpu.dot_dimension_numbers<[1], [0], [0], [1], [0, 0, 1, 1], [], []>} : vector<128x1152xbf16>, vector<1152x128xbf16>, vector<128x128xf32> -> vector<128x128xf32>
    %c0_4 = arith.constant 0 : index
    %c0_5 = arith.constant 0 : index
    %27 = vector.load %arg5[%c0_4, %c0_5] : memref<1x128xf32, #tpu.memory_space<vmem>>, vector<1x128xf32>
    %28 = vector.broadcast %27 : vector<1x128xf32> to vector<128x128xf32>
    %29 = arith.addf %26, %28 : vector<128x128xf32>
    %30 = vector.shape_cast %29 : vector<128x128xf32> to vector<8x16x128xf32>
    %c1_i32_6 = arith.constant 1 : i32
    %31 = arith.muli %1, %c1_i32_6 : i32
    %c0_7 = arith.constant 0 : index
    %32 = arith.index_cast %31 : i32 to index
    %c0_8 = arith.constant 0 : index
    %c0_9 = arith.constant 0 : index
    %33 = vector.load %arg6[%c0_7, %32, %c0_8, %c0_9] : memref<1x10x10x128xbf16, #tpu.memory_space<vmem>>, vector<1x6x10x128xbf16>
    %34 = vector.shape_cast %33 : vector<1x6x10x128xbf16> to vector<6x10x128xbf16>
    %35 = vector.extract_strided_slice %34 {offsets = [0, 0, 0], sizes = [4, 8, 128], strides = [1, 1, 1]} : vector<6x10x128xbf16> to vector<4x8x128xbf16>
    %36 = vector.shape_cast %35 : vector<4x8x128xbf16> to vector<32x128xbf16>
    %37 = vector.extract_strided_slice %34 {offsets = [0, 1, 0], sizes = [4, 8, 128], strides = [1, 1, 1]} : vector<6x10x128xbf16> to vector<4x8x128xbf16>
    %38 = vector.shape_cast %37 : vector<4x8x128xbf16> to vector<32x128xbf16>
    %39 = vector.extract_strided_slice %34 {offsets = [0, 2, 0], sizes = [4, 8, 128], strides = [1, 1, 1]} : vector<6x10x128xbf16> to vector<4x8x128xbf16>
    %40 = vector.shape_cast %39 : vector<4x8x128xbf16> to vector<32x128xbf16>
    %41 = vector.extract_strided_slice %34 {offsets = [1, 0, 0], sizes = [4, 8, 128], strides = [1, 1, 1]} : vector<6x10x128xbf16> to vector<4x8x128xbf16>
    %42 = vector.shape_cast %41 : vector<4x8x128xbf16> to vector<32x128xbf16>
    %43 = vector.extract_strided_slice %34 {offsets = [1, 1, 0], sizes = [4, 8, 128], strides = [1, 1, 1]} : vector<6x10x128xbf16> to vector<4x8x128xbf16>
    %44 = vector.shape_cast %43 : vector<4x8x128xbf16> to vector<32x128xbf16>
    %45 = vector.extract_strided_slice %34 {offsets = [1, 2, 0], sizes = [4, 8, 128], strides = [1, 1, 1]} : vector<6x10x128xbf16> to vector<4x8x128xbf16>
    %46 = vector.shape_cast %45 : vector<4x8x128xbf16> to vector<32x128xbf16>
    %47 = vector.extract_strided_slice %34 {offsets = [2, 0, 0], sizes = [4, 8, 128], strides = [1, 1, 1]} : vector<6x10x128xbf16> to vector<4x8x128xbf16>
    %48 = vector.shape_cast %47 : vector<4x8x128xbf16> to vector<32x128xbf16>
    %49 = vector.extract_strided_slice %34 {offsets = [2, 1, 0], sizes = [4, 8, 128], strides = [1, 1, 1]} : vector<6x10x128xbf16> to vector<4x8x128xbf16>
    %50 = vector.shape_cast %49 : vector<4x8x128xbf16> to vector<32x128xbf16>
    %51 = vector.extract_strided_slice %34 {offsets = [2, 2, 0], sizes = [4, 8, 128], strides = [1, 1, 1]} : vector<6x10x128xbf16> to vector<4x8x128xbf16>
    %52 = vector.shape_cast %51 : vector<4x8x128xbf16> to vector<32x128xbf16>
    %53 = tpu.concatenate %36, %38, %40, %42, %44, %46, %48, %50, %52 in 1 : vector<32x128xbf16>, vector<32x128xbf16>, vector<32x128xbf16>, vector<32x128xbf16>, vector<32x128xbf16>, vector<32x128xbf16>, vector<32x128xbf16>, vector<32x128xbf16>, vector<32x128xbf16> -> vector<32x1152xbf16>
    %c0_10 = arith.constant 0 : index
    %c0_11 = arith.constant 0 : index
    %54 = vector.load %arg7[%c0_10, %c0_11] : memref<1152x128xbf16, #tpu.memory_space<vmem>>, vector<1152x128xbf16>
    %cst_12 = arith.constant dense<0.000000e+00> : vector<32x128xf32>
    %55 = tpu.matmul %53, %54, %cst_12 {dimension_numbers = #tpu.dot_dimension_numbers<[1], [0], [0], [1], [0, 0, 1, 1], [], []>} : vector<32x1152xbf16>, vector<1152x128xbf16>, vector<32x128xf32> -> vector<32x128xf32>
    %c0_13 = arith.constant 0 : index
    %c0_14 = arith.constant 0 : index
    %56 = vector.load %arg8[%c0_13, %c0_14] : memref<1x128xf32, #tpu.memory_space<vmem>>, vector<1x128xf32>
    %57 = vector.broadcast %56 : vector<1x128xf32> to vector<32x128xf32>
    %58 = arith.addf %55, %57 : vector<32x128xf32>
    %59 = vector.shape_cast %58 : vector<32x128xf32> to vector<4x8x128xf32>
    %60 = vector.shape_cast %59 : vector<4x8x128xf32> to vector<4x1x8x1x128xf32>
    %61 = vector.shape_cast %60 : vector<4x1x8x1x128xf32> to vector<4x1x8x1x128xf32>
    %62 = vector.broadcast %61 : vector<4x1x8x1x128xf32> to vector<4x2x8x2x128xf32>
    %63 = vector.shape_cast %62 : vector<4x2x8x2x128xf32> to vector<8x16x128xf32>
    %64 = arith.addf %30, %63 : vector<8x16x128xf32>
    %c0_15 = arith.constant 0 : index
    %c0_16 = arith.constant 0 : index
    %c0_17 = arith.constant 0 : index
    %c0_18 = arith.constant 0 : index
    %65 = vector.load %arg9[%c0_15, %c0_16, %c0_17, %c0_18] : memref<1x8x16x128xf32, #tpu.memory_space<vmem>>, vector<1x8x16x128xf32>
    %66 = vector.shape_cast %65 : vector<1x8x16x128xf32> to vector<8x16x128xf32>
    %67 = vector.shape_cast %64 : vector<8x16x128xf32> to vector<1x8x16x128xf32>
    tpu.vector_store %arg9[%c0_15, %c0_16, %c0_17, %c0_18], %67 {strides = array<i32>} : memref<1x8x16x128xf32, #tpu.memory_space<vmem>>, vector<1x8x16x128xf32>,
    return
  }
  func.func @transform_0(%arg0: i32, %arg1: i32, %arg2: i32) -> (i32, i32, i32, i32) {
    %c0_i32 = arith.constant 0 : i32
    %c0_i32_0 = arith.constant 0 : i32
    %c0_i32_1 = arith.constant 0 : i32
    %c0_i32_2 = arith.constant 0 : i32
    return %arg0, %c0_i32, %c0_i32_0, %c0_i32_1 : i32, i32, i32, i32
  }
  func.func @transform_1(%arg0: i32, %arg1: i32, %arg2: i32) -> (i32, i32) {
    %c0_i32 = arith.constant 0 : i32
    %c0_i32_0 = arith.constant 0 : i32
    return %c0_i32, %arg1 : i32, i32
  }
  func.func @transform_2(%arg0: i32, %arg1: i32, %arg2: i32) -> (i32, i32) {
    %c0_i32 = arith.constant 0 : i32
    %c0_i32_0 = arith.constant 0 : i32
    return %c0_i32, %arg1 : i32, i32
  }
  func.func @transform_3(%arg0: i32, %arg1: i32, %arg2: i32) -> (i32, i32, i32, i32) {
    %c0_i32 = arith.constant 0 : i32
    %c0_i32_0 = arith.constant 0 : i32
    %c0_i32_1 = arith.constant 0 : i32
    %c0_i32_2 = arith.constant 0 : i32
    return %arg0, %c0_i32, %c0_i32_0, %c0_i32_1 : i32, i32, i32, i32
  }
  func.func @transform_4(%arg0: i32, %arg1: i32, %arg2: i32) -> (i32, i32) {
    %c0_i32 = arith.constant 0 : i32
    %c0_i32_0 = arith.constant 0 : i32
    return %c0_i32, %arg1 : i32, i32
  }
  func.func @transform_5(%arg0: i32, %arg1: i32, %arg2: i32) -> (i32, i32) {
    %c0_i32 = arith.constant 0 : i32
    %c0_i32_0 = arith.constant 0 : i32
    return %c0_i32, %arg1 : i32, i32
  }
  func.func @transform_6(%arg0: i32, %arg1: i32, %arg2: i32) -> (i32, i32, i32, i32) {
    %c0_i32 = arith.constant 0 : i32
    %c0_i32_0 = arith.constant 0 : i32
    return %arg0, %arg2, %c0_i32, %arg1 : i32, i32, i32, i32
  }
}

</mosaic_0001>

<bundles_post_ra>
// kernel: tpu_custom_call.1
= control target key start
LH: loop header
LB: loop body
LE: loop exit
PB: predicated region body
PF: predicated region fallthrough
CT: control target
= control target key end

     0   :  { %s5898_s0 = inlined_call_operand.vmem [shape: bf16[2,18,18,128], index: 0, kind: input, shape index: {}]   ;;  %s5899_s1 = inlined_call_operand.vmem [shape: bf16[1152,128], index: 1, kind: input, shape index: {}]   ;;  %s5900_s2 = inlined_call_operand.vmem [shape: f32[1,128], index: 2, kind: input, shape index: {}]   ;;  %s5901_s3 = inlined_call_operand.vmem [shape: bf16[2,10,10,128], index: 3, kind: input, shape index: {}]   ;;  %s5902_s4 = inlined_call_operand.hbm [shape: bf16[1152,128], index: 4, kind: input, shape index: {}]   ;;  %s5903_s5 = inlined_call_operand.vmem [shape: f32[1,128], index: 5, kind: input, shape index: {}]   ;;  %s5904_s6 = inlined_call_operand.hbm [shape: f32[2,16,16,128], index: 6, kind: output, shape index: {}]  }
   0x1   :  { %5911 = sst [smem:[#allocation10_spill]] %s5902_s4 }
   0x2   :  { %11 = vsyncpa [#allocation3], 0 }
   0x3   :  { %12 = vsyncpa [#allocation4], 0 }
   0x4   :  { %14 = vsyncpa [#allocation4 + $0x1], 0  ;;  %s4716_s21 = smov 0   ;;  %s4718_s22 = smov 0  }
   0x5   :  { %s4720_s23 = smov 0   ;;  %s4722_s24 = smov 0  }
   0x6   :  { %s4724_s25 = smov 0   ;;  %s4726_s26 = smov 0  }
   0x7   :  { %s4728_s27 = smov 0   ;;  %s4730_s28 = smov 0  }
   0x8 LB: > { %s3613_s29 = sadd.s32 4294967295, %s4671_s28   ;;  %s3614_s30 = sadd.s32 4294967294, %s4671_s28   ;;  %s4671_s28 = sphi %s4730_s28, %s20_s28   ;;  %s4667_s27 = sphi %s4728_s27, %s5936_s27   ;;  %s4663_s26 = sphi %s4726_s26, %s5935_s26   ;;  %s4659_s25 = sphi %s4724_s25, %s5934_s25   ;;  %s4655_s24 = sphi %s4722_s24, %s5933_s24   ;;  %s4651_s23 = sphi %s4720_s23, %s5932_s23   ;;  %s4647_s22 = sphi %s4718_s22, %s5931_s22   ;;  %s4643_s21 = sphi %s4716_s21, %s5930_s21  }
   0x9   : > { %s32_s7 = sadd.s32 1, %s4663_s26  ;;  %s39_s8 = sadd.s32 1, %s4667_s27 }
   0xa   : > { %p33_p0 = scmp.ge.s32.totalorder %s32_s7, 2  ;;  %s206_s9 = sadd.s32 1, %s4651_s23 }
   0xb   : > { %p216_p1 = scmp.ne.s32.totalorder %s4651_s23, %s4647_s22  ;;  %p217_p2 = scmp.eq.s32.totalorder %s3613_s29, 3 }
   0xc   : > { %s5938_s7 = smov (%p33_p0, %s32_s7), 0  ;;  %s5940_s8 = smov (!%p33_p0, %s39_s8), %s4667_s27 }
   0xd   : > { %5912 = sst [smem:[#allocation8_spill]] %s5938_s7  ;;  %s200_s10 = ssub.s32 %s4663_s26, %s5938_s7 }
   0xe   : > { %p4768_p3 = por %p217_p2, %p216_p1  ;;  %p41_p4 = scmp.ge.s32.totalorder %s5940_s8, 2 }
   0xf   : > { %p222_p5 = scmp.ne.s32.totalorder %s4647_s22, %s4643_s21  ;;  %p223_p6 = scmp.eq.s32.totalorder %s3614_s30, 3 }
  0x10   : > { %s5913_s11 = scalar_select %p4768_p3, 1, 0 }
  0x11   : > { %p3615_p7 = scmp.ge.s32.totalorder %s4671_s28, 1  ;;  %s5942_s8 = smov (%p41_p4, %s5940_s8), 0 }
  0x12   : > { %5914 = sst [smem:[#allocation9_spill]] %s5942_s8  ;;  %p4777_p8 = por %p223_p6, %p222_p5 }
  0x13   : > { %p230_p9 = scmp.lt.s32.totalorder %s4671_s28, 5  ;;  %s199_s13 = ssub.s32 %s4667_s27, %s5942_s8 }
  0x14   : > { %s5915_s12 = scalar_select %p4777_p8, 1, 0 }
  0x15   : > { %s201_s14 = sor.u32 %s200_s10, %s199_s13  ;;  %p4784_p10 = pnand %p3615_p7, %p230_p9 }
  0x16   : > { %p204_p11 = scmp.eq.s32.totalorder %s201_s14, 0  ;;  %p4788_p12 = scmp.eq.s32.totalorder %s3613_s29, 0 }
  0x17   : > { %s5916_s15 = scalar_select %p4784_p10, 1, 0 }
  0x18   : > { %s5917_s16 = scalar_select %p4788_p12, 1, 0 }
  0x19   : > { %p4304_p13 = pneg %p4784_p10  ;;  %s4673_s18 = smov [#allocation2]  }
  0x1a   : > { %s4795_s17 = scalar_select %p204_p11, %s4651_s23, %s206_s9  }
  0x1b   : > { %s257_s19 = sshll.u32 %s4673_s18, 4  ;;  %p4799_p0 = pnand %p4788_p12, %p4304_p13  ;;  %s258_s19 = int_to_ptr.vmem [resolvable:$true] %s257_s19 }
  0x1c   : > { %s5919_s4 = sld [smem:[#allocation10_spill]] }
  0x1d   : > { %p4547_p2 = pneg %p4799_p0 }
  0x22   : > { %s4545_s29 = scalar_lea.hbm %s5919_s4, 9216 }
  0x23   : > { %p4546_p1 = scmp.ne.s32.totalorder %s5919_s4, %s4545_s29  ;;  %p4552_p6 = scmp.lt.u32.totalorder %s4545_s29, %s5919_s4 }
  0x25   : > { %p4548_p4 = pnand %p4547_p2, %p4546_p1 }
  0x27   : > { %p4549_p5 = pneg %p4548_p4 }
  0x29   : > { %p4554_p7 = pnand %p4552_p6, %p4549_p5 }
  0x2b   : > { %4557 = shalt.err (!%p4554_p7)
}
  0x2c   : > { %s4558_s8 = scalar_lea.vmem %s258_s19, 9216  ;;  %p4566_p8 = scmp.lt.s32.totalorder %s258_s19, %s258_s19 }
  0x2d   : > { %p4559_p9 = scmp.ne.s32.totalorder %s258_s19, %s4558_s8  ;;  %p4567_p3 = scmp.lt.s32.totalorder %s4558_s8, %s4558_s8 }
  0x2f   : > { %p4561_p11 = pnand %p4559_p9, %p4547_p2  ;;  %p4568_p12 = por %p4567_p3, %p4566_p8 }
  0x31   : > { %p4562_p13 = pneg %p4561_p11 }
  0x33   : > { %p4569_p10 = pnand %p4568_p12, %p4562_p13 }
  0x35   : > { %4572 = shalt.err (!%p4569_p10)
}
  0x36   : > { %s4674_s30 = smov 64   ;;  %s4675_s10 = smov 4  }
  0x37   : > { %4307 = dma.hbm_to_vmem [thread:$0]  (!%p4799_p0), %s5919_s4, 9216, %s258_s19, [#allocation3], %s4674_s30, %s4674_s30, %s4675_s10  }
  0x38   : > { %p5920_p1 = scmp.ne.s32.totalorder %s5916_s15, 0 }
  0x39   : > { %p5921_p4 = scmp.ne.s32.totalorder (!%p5920_p1), %s5917_s16, 0 }
  0x3a   : > { %295 = sbr.rel (%p5920_p1) target bundleno = 570 (0x23a), region = 44 }
  0x41   : > { %4634 = dma.done.wait (%p5921_p4), [#allocation3], 9216  }
  0x42   : > { %4636 = vsyncadd (%p5921_p4), [#allocation3], 4294958080  ;;  %v4386_v0 = vld [vmem:[%s5899_s1 + $0x40] sm:$0xff]   ;;  %v4390_v4 = vld [vmem:[%s5899_s1 + $0x48] sm:$0xff]   ;;  %p340_p3 = scmp.lt.s32.totalorder %s4659_s25, 1  ;;  %s3846_s19 = smul.u32 96, %s4655_s24 }
  0x43   : > { %v4387_v1 = vld [vmem:[%s5899_s1] sm:$0xff]   ;;  %3850 = vmatprep.subr.bf16.mxu0 %v4386_v0  ;;  %v4391_v5 = vld [vmem:[%s5899_s1 + $0x8] sm:$0xff]   ;;  %v4394_v8 = vld [vmem:[%s5899_s1 + $0x50] sm:$0xff]   ;;  %vm397_vm0 = vsmask.f32 3328  ;;  %vm616_vm2 = vcmask 1042432  }
  0x44   : > { %v4388_v2 = vld [vmem:[%s5899_s1 + $0xc0] sm:$0xff]   ;;  %3851 = vmatpush3.bf16.msra.mxu0 %v4387_v1  ;;  %v4392_v6 = vld [vmem:[%s5899_s1 + $0xc8] sm:$0xff]   ;;  %v4395_v9 = vld [vmem:[%s5899_s1 + $0x10] sm:$0xff]   ;;  %s4881_s8 = scalar_select %p340_p3, %s4659_s25, 1  ;;  %vm398_vm1 = vsmask.f32 7440 }
  0x45   : > { %v4389_v3 = vld [vmem:[%s5899_s1 + $0x80] sm:$0xff]   ;;  %3914 = vmatprep.subr.bf16.mxu1 %v4388_v2  ;;  %3852 = vmatprep.subr.bf16.mxu0 %v4390_v4  ;;  %v4393_v7 = vld [vmem:[%s5899_s1 + $0x88] sm:$0xff]   ;;  %v4396_v10 = vld [vmem:[%s5899_s1 + $0xd0] sm:$0xff]   ;;  %vm617_vm3 = vcmask 1046532   ;;  %s3848_s7 = sshll.u32 %s4655_s24, 5  ;;  %s337_s18 = sand.u32 1, %s4647_s22  }
  0x46   : > { %3915 = vmatpush3.bf16.msra.mxu1 %v4389_v3  ;;  %v4397_v11 = vld [vmem:[%s5899_s1 + $0x90] sm:$0xff]   ;;  %v4398_v12 = vld [vmem:[%s5899_s1 + $0x58] sm:$0xff]   ;;  %v4402_v16 = vld [vmem:[%s5899_s1 + $0x60] sm:$0xff]   ;;  %s4296_s10 = smul.u32 216, %s4881_s8  ;;  %s3623_s20 = sshll.u32 %s337_s18, 7 }
  0x47   : > { %3916 = vmatprep.subr.bf16.mxu1 %v4392_v6  ;;  %v4399_v13 = vld [vmem:[%s5899_s1 + $0x18] sm:$0xff]   ;;  %v4403_v17 = vld [vmem:[%s5899_s1 + $0x20] sm:$0xff]   ;;  %v4406_v20 = vld [vmem:[%s5899_s1 + $0x68] sm:$0xff]   ;;  %s4297_s4 = smul.u32 80, %s4881_s8  ;;  %p5926_p10 = scmp.ne.s32.totalorder %s5913_s11, 0 }
  0x48   : > { %3853 = vmatpush3.bf16.msra.mxu0 %v4391_v5  ;;  %v4400_v14 = vld [vmem:[%s5899_s1 + $0xd8] sm:$0xff]   ;;  %v4404_v18 = vld [vmem:[%s5899_s1 + $0xe0] sm:$0xff]   ;;  %v4407_v21 = vld [vmem:[%s5899_s1 + $0x28] sm:$0xff]   ;;  %s344_s13 = scalar_lea.vmem %s5898_s0, %s4296_s10  ;;  %s3842_s10 = sshll.u32 %s4659_s25, 5 }
  0x49   : > { %3854 = vmatprep.subr.bf16.mxu0 %v4394_v8  ;;  %v4401_v15 = vld [vmem:[%s5899_s1 + $0x98] sm:$0xff]   ;;  %v4405_v19 = vld [vmem:[%s5899_s1 + $0xa0] sm:$0xff]   ;;  %v4408_v22 = vld [vmem:[%s5899_s1 + $0xe8] sm:$0xff]   ;;  %s4921_s15 = scalar_lea.vmem %s344_s13, %s3846_s19  ;;  %s356_s16 = scalar_lea.vmem %s5901_s3, %s4297_s4 }
  0x4a   : > { %3917 = vmatpush3.bf16.msra.mxu1 %v4393_v7  ;;  %v4409_v23 = vld [vmem:[%s5899_s1 + $0xa8] sm:$0xff]   ;;  %v4410_v24 = vld [vmem:[%s5899_s1 + $0x70] sm:$0xff]   ;;  %v4414_v28 = vld [vmem:[%s5899_s1 + $0x78] sm:$0xff]   ;;  %s5386_s13 = scalar_lea.vmem %s356_s16, %s3848_s7  ;;  %s5763_s4 = scalar_lea.vmem [#allocation5], %s3623_s20 }
  0x4b   : > { %3918 = vmatprep.subr.bf16.mxu1 %v4396_v10  ;;  %v4411_v25 = vld [vmem:[%s5899_s1 + $0x30] sm:$0xff]   ;;  %v4415_v29 = vld [vmem:[%s5899_s1 + $0x38] sm:$0xff]   ;;  %v4930_v31 = vld [vmem:[%s4921_s15] sm:$0xf]  ;;  %s3849_s7 = sshll.u32 %s4655_s24, 4  ;;  %s3464_s30 = sshll.u32 %s5763_s4, 4  ;;  %s5836_s30 = int_to_ptr.vmem [resolvable:$true] %s3464_s30 }
  0x4c   : > { %3855 = vmatpush3.bf16.msra.mxu0 %v4395_v9  ;;  %v4412_v26 = vld [vmem:[%s5899_s1 + $0xf0] sm:$0xff]   ;;  %v4416_v30 = vld [vmem:[%s5899_s1 + $0xf8] sm:$0xff]   ;;  %v4933_v32 = vld [vmem:[%s4921_s15 + $0x4] sm:$0xf]  ;;  %v401_v34 = vshrl.u32 %v4930_v31, 16  ;;  %v404_v35 = vshll.u32 %v4930_v31, 16  ;;  %s3461_s24 = sadd.s32 %s3849_s7, %s3842_s10 }
  0x4d   : > { %3856 = vmatprep.subr.bf16.mxu0 %v4398_v12  ;;  %v4413_v27 = vld [vmem:[%s5899_s1 + $0xb0] sm:$0xff]   ;;  %v369_v33 = vld [vmem:[%s4921_s15 + $0x8] sm:$0x1]  ;;  %v410_v36 = vshll.u32 %v4933_v32, 16  ;;  %v414_v37 = vshrl.u32 %v4933_v32, 16  ;;  %v4417_v39 = vld [vmem:[%s5899_s1 + $0xb8] sm:$0xff]   ;;  %v3640_v7 = vcombine.low %v4930_v31, %v4933_v32 }
  0x4e   : > { %3919 = vmatpush3.bf16.msra.mxu1 %v4397_v11  ;;  %v420_v38 = vshll.u32 %v369_v33, 16  ;;  %v4419_v40 = vld [vmem:[%s5899_s1 + $0x140] sm:$0xff]   ;;  %v403_v41 = vrot.slane %v401_v34, 4  ;;  %v406_v42 = vrot.slane %v404_v35, 5  ;;  %v624_v46 = vrot.slane %v369_v33, 5  ;;  %vm4956_vm4 = vmor %vm397_vm0, %vm398_vm1  ;;  %s3843_s25 = sshll.u32 %s3461_s24, 7 }
  0x4f   : > { %3920 = vmatprep.subr.bf16.mxu1 %v4400_v14  ;;  %v412_v43 = vrot.slane %v410_v36, 5  ;;  %v416_v44 = vrot.slane %v414_v37, 4  ;;  %v4947_v47 = vld [vmem:[%s4921_s15 + $0xc] sm:$0xf]  ;;  %v4950_v50 = vld [vmem:[%s4921_s15 + $0x10] sm:$0xf]  ;;  %vm4969_vm5 = vmor %vm616_vm2, %vm617_vm3  ;;  %s5834_s16 = scalar_lea.hbm %s5904_s6, %s3843_s25 }
  0x50   : > { %3857 = vmatpush3.bf16.msra.mxu0 %v4399_v13  ;;  %v422_v45 = vrot.slane %v420_v38, 5  ;;  %v407_v48 = vor.u32 %v406_v42, %v403_v41  ;;  %v425_v51 = vshrl.u32 %v4947_v47, 16  ;;  %v428_v52 = vshll.u32 %v4947_v47, 16  ;;  %v372_v63 = vld [vmem:[%s4921_s15 + $0x14] sm:$0x1]  ;;  %v4421_v1 = vld [vmem:[%s5899_s1 + $0x100] sm:$0xff]  }
  0x51   : > { %3858 = vmatprep.subr.bf16.mxu0 %v4402_v16  ;;  %v417_v49 = vor.u32 %v416_v44, %v412_v43  ;;  %v434_v54 = vshll.u32 %v4950_v50, 16  ;;  %v438_v55 = vshrl.u32 %v4950_v50, 16  ;;  %v4964_v56 = vcombine.low %v4947_v47, %v4950_v50  ;;  %v4986_v9 = vld [vmem:[%s4921_s15 + $0x18] sm:$0xf]  ;;  %v4989_v10 = vld [vmem:[%s4921_s15 + $0x1c] sm:$0xf] }
  0x52   : > { %3921 = vmatpush3.bf16.msra.mxu1 %v4401_v15  ;;  %v3630_v57 = vrot.slane %v4930_v31, 9  ;;  %v408_v58 = vrot.slane %v407_v48, 4  ;;  %v427_v60 = vrot.slane %v425_v51, 4  ;;  %v430_v61 = vrot.slane %v428_v52, 5  ;;  %v4422_v15 = vld [vmem:[%s5899_s1 + $0x148] sm:$0xff]   ;;  %v4427_v36 = vld [vmem:[%s5899_s1 + $0x150] sm:$0xff]  }
  0x53   : > { %3922 = vmatprep.subr.bf16.mxu1 %v4404_v18  ;;  %v418_v59 = vrot.slane %v417_v49, 4  ;;  %v440_v0 = vrot.slane %v438_v55, 4  ;;  %1575 = vmatprep.mubr.bf16.mxu1 %v4964_v56  ;;  %v621_v2 = vrot.slane %v4933_v32, 5  ;;  %v436_v3 = vrot.slane %v434_v54, 5  ;;  %v375_v33 = vld [vmem:[%s4921_s15 + $0x20] sm:$0x1] }
  0x54   : > { %3859 = vmatpush3.bf16.msra.mxu0 %v4403_v17  ;;  %v444_v4 = vshll.u32 %v372_v63, 16  ;;  %v413_v5 = vsel %vm4956_vm4, %v408_v58, %v412_v43  ;;  %v431_v8 = vor.u32 %v430_v61, %v427_v60  ;;  %v449_v18 = vshrl.u32 %v4986_v9, 16  ;;  %v5031_v44 = vld [vmem:[%s4921_s15 + $0x24] sm:$0xf]  ;;  %v4430_v55 = vld [vmem:[%s5899_s1 + $0x1c8] sm:$0xff]   ;;  %s4678_s14 = smov [#allocation5]  }
  0x55   : > { %3860 = vmatprep.subr.bf16.mxu0 %v4406_v20  ;;  %v423_v6 = vsel %vm4956_vm4, %v418_v59, %v422_v45  ;;  %v622_v12 = vsel %vm4969_vm5, %v3630_v57, %v621_v2  ;;  %v623_v13 = vrot.slane %v621_v2, 4  ;;  %v441_v14 = vor.u32 %v440_v0, %v436_v3  ;;  %v5034_v45 = vld [vmem:[%s4921_s15 + $0x28] sm:$0xf]  ;;  %v5564_v62 = vld [vmem:[%s5900_s2] ss:$0 sm:$0xff]  ;;  %s4577_s29 = sshll.u32 %s4678_s14, 4  ;;  %s4578_s29 = int_to_ptr.vmem [resolvable:$false] %s4577_s29 }
  0x56   : > { %3923 = vmatpush3.bf16.msra.mxu1 %v4405_v19  ;;  %v3648_v11 = vcombine.low %v413_v5, %v423_v6  ;;  %v432_v16 = vrot.slane %v431_v8, 4  ;;  %v446_v17 = vrot.slane %v444_v4, 5  ;;  %v452_v19 = vshll.u32 %v4986_v9, 16  ;;  %v4431_v0 = vld [vmem:[%s5899_s1 + $0x188] sm:$0xff]   ;;  %v4432_v6 = vld [vmem:[%s5899_s1 + $0x158] sm:$0xff]   ;;  %s4579_s9 = scalar_lea.vmem %s4578_s29, 4096  ;;  %p4580_p2 = scmp.lt.s32.totalorder %s5836_s30, %s4578_s29 }
  0x57   : > { %3924 = vmatprep.subr.bf16.mxu1 %v4408_v22  ;;  %v625_v20 = vsel %vm4969_vm5, %v623_v13, %v624_v46  ;;  %v462_v22 = vshrl.u32 %v4989_v10, 16  ;;  %v631_v32 = vrot.slane %v372_v63, 5  ;;  %v451_v34 = vrot.slane %v449_v18, 4  ;;  %v378_v4 = vld [vmem:[%s4921_s15 + $0x2c] sm:$0x1]  ;;  %v4434_v18 = vld [vmem:[%s5899_s1 + $0x118] sm:$0xff]  }
  0x58   : > { %3861 = vmatpush3.bf16.msra.mxu0 %v4407_v21  ;;  %1478 = vmatprep.mubr.bf16.mxu0 %v3648_v11  ;;  %v442_v21 = vrot.slane %v441_v14, 4  ;;  %v454_v35 = vrot.slane %v452_v19, 5  ;;  %v468_v43 = vshll.u32 %v375_v33, 16  ;;  %v473_v48 = vshrl.u32 %v5031_v44, 16  ;;  %v5076_v13 = vld [vmem:[%s4921_s15 + $0x34] sm:$0xf] }
  0x59   : > { %3862 = vmatprep.subr.bf16.mxu0 %v4410_v24  ;;  %v4424_v24 = vld [vmem:[%s5899_s1 + $0x108] sm:$0xff]   ;;  %v464_v42 = vrot.slane %v462_v22, 4  ;;  %v476_v49 = vshll.u32 %v5031_v44, 16  ;;  %v486_v54 = vshrl.u32 %v5034_v45, 16  ;;  %v3632_v59 = vrot.slane %v4986_v9, 9 }
  0x5a   : > { %3925 = vmatpush3.bf16.msra.mxu1 %v4409_v23  ;;  %v5003_v23 = vcombine.low %v4986_v9, %v4989_v10  ;;  %v447_v31 = vsel %vm4956_vm4, %v442_v21, %v446_v17  ;;  %v455_v41 = vor.u32 %v454_v35, %v451_v34  ;;  %v470_v52 = vrot.slane %v468_v43, 5  ;;  %v381_v35 = vld [vmem:[%s4921_s15 + $0x38] sm:$0x1] }
  0x5b   : > { %3926 = vmatprep.subr.bf16.mxu1 %v4412_v26  ;;  %v4426_v26 = vld [vmem:[%s5899_s1 + $0x180] sm:$0xff]   ;;  %v635_v60 = vrot.slane %v4989_v10, 5  ;;  %v5054_v61 = vcombine.low %v5031_v44, %v5034_v45  ;;  %v638_v63 = vrot.slane %v375_v33, 5  ;;  %v475_v5 = vrot.slane %v473_v48, 4  ;;  %v5120_v48 = vld [vmem:[%s4921_s15 + $0x3c] sm:$0xf] }
  0x5c   : > { %3863 = vmatpush3.bf16.msra.mxu0 %v4411_v25  ;;  %v4425_v25 = vld [vmem:[%s5899_s1 + $0x1c0] sm:$0xff]   ;;  %v456_v51 = vrot.slane %v455_v41, 4  ;;  %v482_v8 = vshll.u32 %v5034_v45, 16  ;;  %v488_v9 = vrot.slane %v486_v54, 4  ;;  %v510_v22 = vshrl.u32 %v5076_v13, 16 }
  0x5d   : > { %3864 = vmatprep.subr.bf16.mxu0 %v4414_v28  ;;  %v437_v28 = vsel %vm4956_vm4, %v432_v16, %v436_v3  ;;  %v637_v3 = vrot.slane %v635_v60, 4  ;;  %v636_v11 = vsel %vm4969_vm5, %v3632_v59, %v635_v60  ;;  %v5129_v54 = vld [vmem:[%s4921_s15 + $0x40] sm:$0xf]  ;;  %v524_v60 = vshll.u32 %v5120_v48, 16 }
  0x5e   : > { %3927 = vmatpush3.bf16.msra.mxu1 %v4413_v27  ;;  %v3656_v27 = vcombine.low %v622_v12, %v625_v20  ;;  %v5024_v37 = vcombine.low %v437_v28, %v447_v31  ;;  %v5073_v12 = vld [vmem:[%s4921_s15 + $0x30] sm:$0xf]  ;;  %v484_v17 = vrot.slane %v482_v8, 5  ;;  %v642_v31 = vrot.slane %v5034_v45, 5 }
  0x5f   : > { %3928 = vmatprep.subr.bf16.mxu1 %v4416_v30  ;;  %v628_v30 = vrot.slane %v4950_v50, 5  ;;  %v4429_v50 = vld [vmem:[%s5899_s1 + $0x110] sm:$0xff]   ;;  %v497_v20 = vshrl.u32 %v5073_v12, 16  ;;  %v500_v21 = vshll.u32 %v5073_v12, 16  ;;  %v512_v43 = vrot.slane %v510_v22, 4 }
  0x60   : > { %3865 = vmatpush3.bf16.msra.mxu0 %v4415_v29  ;;  %v3631_v29 = vrot.slane %v4947_v47, 9  ;;  %v4436_v28 = vld [vmem:[%s5899_s1 + $0x190] sm:$0xff]   ;;  %v644_v41 = vrot.slane %v642_v31, 4 }
  0x61   : > { %3978 = vmatprep.subr.bf16.mxu0 %v4419_v40  ;;  %v630_v38 = vrot.slane %v628_v30, 4 }
  0x62   : > { %3929 = vmatpush3.bf16.msra.mxu1 %v4417_v39  ;;  %v458_v39 = vshll.u32 %v4989_v10, 16  ;;  %v629_v40 = vsel %vm4969_vm5, %v3631_v29, %v628_v30  ;;  %v5101_v30 = vcombine.low %v5073_v12, %v5076_v13 }
  0x63   : > { %1479 = vmatmul.mubr.bf16.vlgmr.msra.gmra.mrb[0].mxu0 %v3640_v7  ;;  %4042 = vmatprep.subr.bf16.mxu1 %v4425_v25  ;;  %v632_v46 = vsel %vm4969_vm5, %v630_v38, %v631_v32  ;;  %v478_v7 = vrot.slane %v476_v49, 5  ;;  %v489_v25 = vor.u32 %v488_v9, %v484_v17  ;;  %v645_v32 = vrot.slane %v378_v4, 5 }
  0x64   : > { %3979 = vmatpush3.bf16.msra.mxu0 %v4421_v1  ;;  %1486 = vmatprep.mubr.bf16.mxu0 %v5024_v37  ;;  %v460_v47 = vrot.slane %v458_v39, 5  ;;  %v5048_v57 = vcombine.low %v629_v40, %v632_v46  ;;  %v502_v38 = vrot.slane %v500_v21, 5  ;;  %v4437_v39 = vld [vmem:[%s5899_s1 + $0x160] sm:$0xff]   ;;  %v3634_v49 = vrot.slane %v5073_v12, 9 }
  0x65   : > { %1576 = vmatmul.mubr.bf16.vlgmr.msra.gmra.mrb[0].mxu1 %v3656_v27  ;;  %3980 = vmatprep.subr.bf16.mxu0 %v4422_v15  ;;  %v639_v15 = vsel %vm4969_vm5, %v637_v3, %v638_v63  ;;  %v479_v16 = vor.u32 %v478_v7, %v475_v5  ;;  %v4435_v27 = vld [vmem:[%s5899_s1 + $0x1d0] sm:$0xff]   ;;  %v490_v34 = vrot.slane %v489_v25, 4  ;;  %v4440_v63 = vld [vmem:[%s5899_s1 + $0x1d8] sm:$0xff]   ;;  %v652_v5 = vrot.slane %v381_v35, 5 }
  0x66   : > { %1583 = vmatprep.mubr.bf16.mxu1 %v5003_v23  ;;  %4043 = vmatpush3.bf16.msra.mxu1 %v4426_v26  ;;  %v465_v58 = vor.u32 %v464_v42, %v460_v47  ;;  %v461_v1 = vsel %vm4956_vm4, %v456_v51, %v460_v47  ;;  %v3633_v26 = vrot.slane %v5031_v44, 9  ;;  %v5097_v29 = vcombine.low %v636_v11, %v639_v15  ;;  %v4439_v44 = vld [vmem:[%s5899_s1 + $0x120] sm:$0xff]   ;;  %v4442_v11 = vld [vmem:[%s5899_s1 + $0x168] sm:$0xff]  }
  0x67   : > { %4044 = vmatprep.subr.bf16.mxu1 %v4430_v55  ;;  %v506_v42 = vshll.u32 %v5076_v13, 16  ;;  %v516_v47 = vshll.u32 %v381_v35, 16  ;;  %v646_v51 = vsel %vm4969_vm5, %v644_v41, %v645_v32  ;;  %v521_v55 = vshrl.u32 %v5120_v48, 16  ;;  %v4445_v35 = vld [vmem:[%s5899_s1 + $0x1e0] sm:$0xff]  }
  0x68   : > { %3981 = vmatpush3.bf16.msra.mxu0 %v4424_v24  ;;  %v466_v2 = vrot.slane %v465_v58, 4  ;;  %v480_v24 = vrot.slane %v479_v16, 4  ;;  %v643_v40 = vsel %vm4969_vm5, %v3633_v26, %v642_v31  ;;  %v526_v12 = vrot.slane %v524_v60, 5  ;;  %v4444_v26 = vld [vmem:[%s5899_s1 + $0x128] sm:$0xff]   ;;  %v5214_v60 = vld [vmem:[%s4921_s15 + $0x54] sm:$0xf] }
  0x69   : > { %3982 = vmatprep.subr.bf16.mxu0 %v4427_v36  ;;  %v499_v36 = vrot.slane %v497_v20, 4  ;;  %v518_v59 = vrot.slane %v516_v47, 5  ;;  %v5140_v3 = vcombine.low %v643_v40, %v646_v51  ;;  %v5168_v20 = vld [vmem:[%s4921_s15 + $0x4c] sm:$0xf]  ;;  %v656_v40 = vrot.slane %v5129_v54, 5 }
  0x6a   : > { %4045 = vmatpush3.bf16.msra.mxu1 %v4431_v0  ;;  %v471_v10 = vsel %vm4956_vm4, %v466_v2, %v470_v52  ;;  %v485_v33 = vsel %vm4956_vm4, %v480_v24, %v484_v17  ;;  %v508_v52 = vrot.slane %v506_v42, 5  ;;  %v649_v2 = vrot.slane %v5076_v13, 5 }
  0x6b   : > { %1487 = vmatmul.mubr.bf16.gmra.mrb[4].mxu0 %v4964_v56  ;;  %v492_v56 = vshll.u32 %v378_v4, 16  ;;  %v5078_v14 = vcombine.low %v461_v1, %v471_v10  ;;  %4046 = vmatprep.subr.bf16.mxu1 %v4435_v27  ;;  %v503_v46 = vor.u32 %v502_v38, %v499_v36  ;;  %v534_v1 = vshrl.u32 %v5129_v54, 16  ;;  %v4446_v36 = vld [vmem:[%s5899_s1 + $0x1a0] sm:$0xff]  }
  0x6c   : > { %3983 = vmatpush3.bf16.msra.mxu0 %v4429_v50  ;;  %v513_v0 = vor.u32 %v512_v43, %v508_v52  ;;  %v5144_v4 = vcombine.low %v5120_v48, %v5129_v54  ;;  %v651_v9 = vrot.slane %v649_v2, 4  ;;  %v523_v10 = vrot.slane %v521_v55, 4  ;;  %v5196_v43 = vld [vmem:[%s4921_s15 + $0x50] sm:$0x1] }
  0x6d   : > { %1584 = vmatmul.mubr.bf16.gmra.mrb[4].mxu1 %v5048_v57  ;;  %3984 = vmatprep.subr.bf16.mxu0 %v4432_v6  ;;  %v494_v19 = vrot.slane %v492_v56, 5  ;;  %v504_v58 = vrot.slane %v503_v46, 4  ;;  %v4441_v6 = vld [vmem:[%s5899_s1 + $0x198] sm:$0xff]   ;;  %v5152_v56 = vld [vmem:[%s4921_s15 + $0x44] sm:$0x1]  ;;  %v530_v13 = vshll.u32 %v5129_v54, 16 }
  0x6e   : > { %1591 = vmatprep.mubr.bf16.mxu1 %v5054_v61  ;;  %1494 = vmatprep.mubr.bf16.mxu0 %v5078_v14  ;;  %v514_v8 = vrot.slane %v513_v0, 4  ;;  %v536_v15 = vrot.slane %v534_v1, 4  ;;  %v540_v16 = vshll.u32 %v5152_v56, 16  ;;  %v653_v22 = vsel %vm4969_vm5, %v651_v9, %v652_v5  ;;  %v4447_v46 = vld [vmem:[%s5899_s1 + $0x170] sm:$0xff]   ;;  %v5220_v1 = vld [vmem:[%s4921_s15 + $0x58] sm:$0xf] }
  0x6f   : > { %4047 = vmatpush3.bf16.msra.mxu1 %v4436_v28  ;;  %v495_v45 = vsel %vm4956_vm4, %v490_v34, %v494_v19  ;;  %v509_v7 = vsel %vm4956_vm4, %v504_v58, %v508_v52  ;;  %v5165_v19 = vld [vmem:[%s4921_s15 + $0x48] sm:$0xf]  ;;  %v527_v24 = vor.u32 %v526_v12, %v523_v10  ;;  %v532_v25 = vrot.slane %v530_v13, 5  ;;  %v4449_v52 = vld [vmem:[%s5899_s1 + $0x130] sm:$0xff]  }
  0x70   : > { %3985 = vmatpush3.bf16.msra.mxu0 %v4434_v18  ;;  %v5124_v50 = vcombine.low %v485_v33, %v495_v45  ;;  %4048 = vmatprep.subr.bf16.mxu1 %v4440_v63  ;;  %v519_v17 = vsel %vm4956_vm4, %v514_v8, %v518_v59  ;;  %v650_v18 = vsel %vm4969_vm5, %v3634_v49, %v649_v2  ;;  %v545_v27 = vshrl.u32 %v5165_v19, 16  ;;  %v4450_v8 = vld [vmem:[%s5899_s1 + $0x1e8] sm:$0xff]  }
  0x71   : > { %3986 = vmatprep.subr.bf16.mxu0 %v4437_v39  ;;  %v5170_v21 = vcombine.low %v509_v7, %v519_v17  ;;  %v548_v28 = vshll.u32 %v5165_v19, 16  ;;  %v558_v31 = vshrl.u32 %v5168_v20, 16  ;;  %v528_v32 = vrot.slane %v527_v24, 4  ;;  %v4451_v13 = vld [vmem:[%s5899_s1 + $0x1a8] sm:$0xff]  }
  0x72   : > { %v537_v33 = vor.u32 %v536_v15, %v532_v25  ;;  %v542_v34 = vrot.slane %v540_v16, 5  ;;  %v5189_v38 = vcombine.low %v650_v18, %v653_v22  ;;  %v3635_v39 = vrot.slane %v5120_v48, 9  ;;  %v390_v18 = vld [vmem:[%s4921_s15 + $0x5c] sm:$0x1] }
  0x73   : > { %1495 = vmatmul.mubr.bf16.gmra.mrb[8].mxu0 %v5003_v23  ;;  %4049 = vmatpush3.bf16.msra.mxu1 %v4441_v6  ;;  %v533_v41 = vsel %vm4956_vm4, %v528_v32, %v532_v25  ;;  %v550_v45 = vrot.slane %v548_v28, 5  ;;  %v5203_v47 = vcombine.low %v5165_v19, %v5168_v20  ;;  %v659_v48 = vrot.slane %v5152_v56, 5  ;;  %v4452_v22 = vld [vmem:[%s5899_s1 + $0x178] sm:$0xff]  }
  0x74   : > { %3987 = vmatpush3.bf16.msra.mxu0 %v4439_v44  ;;  %1502 = vmatprep.mubr.bf16.mxu0 %v5124_v50  ;;  %v538_v42 = vrot.slane %v537_v33, 4  ;;  %v547_v44 = vrot.slane %v545_v27, 4  ;;  %v554_v49 = vshll.u32 %v5168_v20, 16  ;;  %v560_v51 = vrot.slane %v558_v31, 4 }
  0x75   : > { %1592 = vmatmul.mubr.bf16.gmra.mrb[8].mxu1 %v5097_v29  ;;  %3988 = vmatprep.subr.bf16.mxu0 %v4442_v11  ;;  %v658_v55 = vrot.slane %v656_v40, 4  ;;  %v564_v59 = vshll.u32 %v5196_v43, 16  ;;  %v569_v2 = vshrl.u32 %v5214_v60, 16  ;;  %v572_v7 = vshll.u32 %v5214_v60, 16 }
  0x76   : > { %1599 = vmatprep.mubr.bf16.mxu1 %v5101_v30  ;;  %4050 = vmatprep.subr.bf16.mxu1 %v4445_v35  ;;  %v543_v54 = vsel %vm4956_vm4, %v538_v42, %v542_v34  ;;  %v551_v58 = vor.u32 %v550_v45, %v547_v44  ;;  %v556_v0 = vrot.slane %v554_v49, 5  ;;  %v582_v56 = vshrl.u32 %v5220_v1, 16  ;;  %v4456_v44 = vld [vmem:[%s5899_s1 + $0x1b0] sm:$0xff]   ;;  %v5271_v45 = vld [vmem:[%s4921_s15 + $0x60] sm:$0xf] }
  0x77   : > { %4051 = vmatpush3.bf16.msra.mxu1 %v4446_v36  ;;  %v5217_v63 = vcombine.low %v533_v41, %v543_v54  ;;  %v566_v6 = vrot.slane %v564_v59, 5  ;;  %v663_v10 = vrot.slane %v5168_v20, 5  ;;  %v657_v11 = vsel %vm4969_vm5, %v3635_v39, %v656_v40  ;;  %v4454_v39 = vld [vmem:[%s5899_s1 + $0x138] sm:$0xff]  }
  0x78   : > { %3989 = vmatpush3.bf16.msra.mxu0 %v4444_v26  ;;  %v552_v5 = vrot.slane %v551_v58, 4  ;;  %v561_v9 = vor.u32 %v560_v51, %v556_v0  ;;  %v660_v12 = vsel %vm4969_vm5, %v658_v55, %v659_v48  ;;  %4052 = vmatprep.subr.bf16.mxu1 %v4450_v8  ;;  %v3636_v17 = vrot.slane %v5165_v19, 9  ;;  %v4457_v55 = vld [vmem:[%s5899_s1 + $0x1f8] sm:$0xff]  }
  0x79   : > { %3990 = vmatprep.subr.bf16.mxu0 %v4447_v46  ;;  %v571_v20 = vrot.slane %v569_v2, 4  ;;  %v574_v24 = vrot.slane %v572_v7, 5  ;;  %v578_v25 = vshll.u32 %v5220_v1, 16  ;;  %v584_v26 = vrot.slane %v582_v56, 4  ;;  %v5274_v46 = vld [vmem:[%s4921_s15 + $0x64] sm:$0xf] }
  0x7a   : > { %v557_v15 = vsel %vm4956_vm4, %v552_v5, %v556_v0  ;;  %v562_v16 = vrot.slane %v561_v9, 4  ;;  %v588_v27 = vshll.u32 %v390_v18, 16  ;;  %v5247_v28 = vcombine.low %v657_v11, %v660_v12  ;;  %v4458_v58 = vld [vmem:[%s5899_s1 + $0x1b8] sm:$0xff]   ;;  %v4459_v0 = vld [vmem:[%s5899_s1 + $0x200] sm:$0xff]   ;;  %v4460_v11 = vld [vmem:[%s5899_s1 + $0x208] sm:$0xff]  }
  0x7b   : > { %1503 = vmatmul.mubr.bf16.gmra.mrb[12].mxu0 %v5054_v61  ;;  %4053 = vmatpush3.bf16.msra.mxu1 %v4451_v13  ;;  %v665_v32 = vrot.slane %v663_v10, 4  ;;  %v666_v19 = vrot.slane %v5196_v43, 5  ;;  %v5256_v34 = vcombine.low %v5214_v60, %v5220_v1  ;;  %v575_v35 = vor.u32 %v574_v24, %v571_v20  ;;  %v4455_v43 = vld [vmem:[%s5899_s1 + $0x1f0] sm:$0xff]   ;;  %v4461_v9 = vld [vmem:[#allocation2 + $0x40] sm:$0xff]   ;;  %v4464_v13 = vld [vmem:[#allocation2 + $0x48] sm:$0xff]  }
  0x7c   : > { %1510 = vmatprep.mubr.bf16.mxu0 %v5170_v21  ;;  %3991 = vmatpush3.bf16.msra.mxu0 %v4449_v52  ;;  %v567_v31 = vsel %vm4956_vm4, %v562_v16, %v566_v6  ;;  %v580_v36 = vrot.slane %v578_v25, 5  ;;  %v590_v42 = vrot.slane %v588_v27, 5  ;;  %v670_v48 = vrot.slane %v5220_v1, 5  ;;  %v4462_v12 = vld [vmem:[#allocation2] sm:$0xff]   ;;  %v4468_v25 = vld [vmem:[#allocation2 + $0x10] sm:$0xff]   ;;  %v4470_v27 = vld [vmem:[#allocation2 + $0x58] sm:$0xff]  }
  0x7d   : > { %1600 = vmatmul.mubr.bf16.gmra.mrb[12].mxu1 %v5140_v3  ;;  %3992 = vmatprep.subr.bf16.mxu0 %v4452_v22  ;;  %v5252_v33 = vcombine.low %v557_v15, %v567_v31  ;;  %v576_v40 = vrot.slane %v575_v35, 4  ;;  %v664_v49 = vsel %vm4969_vm5, %v3636_v17, %v663_v10  ;;  %v667_v51 = vsel %vm4969_vm5, %v665_v32, %v666_v19  ;;  %v4469_v32 = vld [vmem:[%s5899_s1 + $0x220] sm:$0xff]   ;;  %v4471_v35 = vld [vmem:[#allocation2 + $0x18] sm:$0xff]  }
  0x7e   : > { %1607 = vmatprep.mubr.bf16.mxu1 %v5144_v4  ;;  %v585_v41 = vor.u32 %v584_v26, %v580_v36  ;;  %4054 = vmatprep.subr.bf16.mxu1 %v4455_v43  ;;  %v5295_v1 = vcombine.low %v664_v49, %v667_v51  ;;  %v3637_v5 = vrot.slane %v5214_v60, 9  ;;  %v673_v6 = vrot.slane %v390_v18, 5  ;;  %v4467_v18 = vld [vmem:[#allocation2 + $0x50] sm:$0xff]   ;;  %v5360_v49 = vld [vmem:[%s4921_s15 + $0x68] sm:$0x1] }
  0x7f   : > { %v581_v52 = vsel %vm4956_vm4, %v576_v40, %v580_v36  ;;  %4055 = vmatpush3.bf16.msra.mxu1 %v4456_v44  ;;  %v5302_v7 = vcombine.low %v5271_v45, %v5274_v46  ;;  %v672_v8 = vrot.slane %v670_v48, 4  ;;  %v676_v15 = vshrl.u32 %v5271_v45, 16  ;;  %v4475_v43 = vld [vmem:[%s5899_s1 + $0x230] sm:$0xff]   ;;  %v4477_v51 = vld [vmem:[#allocation2 + $0x28] sm:$0xff]  }
  0x80   : > { %3993 = vmatpush3.bf16.msra.mxu0 %v4454_v39  ;;  %v586_v54 = vrot.slane %v585_v41, 4  ;;  %4056 = vmatprep.subr.bf16.mxu1 %v4457_v55  ;;  %v671_v60 = vsel %vm4969_vm5, %v3637_v5, %v670_v48  ;;  %v679_v16 = vshll.u32 %v5271_v45, 16  ;;  %v689_v17 = vshrl.u32 %v5274_v46, 16  ;;  %v4474_v41 = vld [vmem:[#allocation2 + $0x20] sm:$0xff]   ;;  %v4476_v48 = vld [vmem:[#allocation2 + $0x68] sm:$0xff]   ;;  %v4478_v55 = vld [vmem:[%s5899_s1 + $0x238] sm:$0xff]  }
  0x81   : > { %4244 = vmatprep.subr.bf16.mxu0 %v4459_v0  ;;  %v674_v56 = vsel %vm4969_vm5, %v672_v8, %v673_v6  ;;  %v685_v20 = vshll.u32 %v5274_v46, 16  ;;  %v678_v22 = vrot.slane %v676_v15, 4  ;;  %v3638_v40 = vrot.slane %v5271_v45, 9  ;;  %v4482_v5 = vld [vmem:[#allocation2 + $0x78] sm:$0xff]   ;;  %v5396_v15 = vld [vmem:[%s4921_s15 + $0x74] sm:$0x1] }
  0x82   : > { %v591_v59 = vsel %vm4956_vm4, %v586_v54, %v590_v42  ;;  %v5312_v10 = vcombine.low %v671_v60, %v674_v56  ;;  %v681_v24 = vrot.slane %v679_v16, 5  ;;  %v691_v26 = vrot.slane %v689_v17, 4  ;;  %v4484_v60 = vld [vmem:[#allocation2 + $0xc0] sm:$0xff]   ;;  %v4483_v56 = vld [vmem:[#allocation2 + $0x38] sm:$0xff]  }
  0x83   : > { %1511 = vmatmul.mubr.bf16.gmra.mrb[16].mxu0 %v5101_v30  ;;  %v5297_v2 = vcombine.low %v581_v52, %v591_v59  ;;  %4057 = vmatpush3.bf16.msra.mxu1 %v4458_v58  ;;  %v5336_v31 = vrot.slane %v685_v20, 5  ;;  %v704_v42 = vrot.slane %v5274_v46, 5  ;;  %v4480_v52 = vld [vmem:[#allocation2 + $0x70] sm:$0xff]   ;;  %v695_v54 = vshll.u32 %v5360_v49, 16 }
  0x84   : > { %1518 = vmatprep.mubr.bf16.mxu0 %v5217_v63  ;;  %4122 = vmatprep.subr.bf16.mxu1 %v4461_v9  ;;  %v682_v19 = vor.u32 %v681_v24, %v678_v22  ;;  %v4481_v59 = vld [vmem:[#allocation2 + $0x30] sm:$0xff]   ;;  %v5406_v22 = vld [vmem:[%s5386_s13 + $0x4] sm:$0x1] }
  0x85   : > { %1608 = vmatmul.mubr.bf16.gmra.mrb[16].mxu1 %v5189_v38  ;;  %v692_v36 = vor.u32 %v691_v26, %v5336_v31  ;;  %v697_v6 = vrot.slane %v695_v54, 5  ;;  %v5431_v54 = vld [vmem:[%s5386_s13 + $0x18] sm:$0xf] }
  0x86   : > { %1615 = vmatprep.mubr.bf16.mxu1 %v5203_v47  ;;  %v5348_v39 = vrot.slane %v682_v19, 4  ;;  %v1989_v46 = vshrl.u32 %v5431_v54, 16 }
  0x87   : > { %v5356_v44 = vrot.slane %v692_v36, 4  ;;  %v1956_v36 = vshll.u32 %v5406_v22, 16 }
  0x89   : > { %v698_v24 = vsel %vm4956_vm4, %v5356_v44, %v697_v6 }
  0x8b   : > { %1519 = vmatmul.mubr.bf16.gmra.mrb[20].mxu0 %v5144_v4 }
  0x8c   : > { %1526 = vmatprep.mubr.bf16.mxu0 %v5252_v33 }
  0x8d   : > { %1616 = vmatmul.mubr.bf16.gmra.mrb[20].mxu1 %v5247_v28 }
  0x8e   : > { %1623 = vmatprep.mubr.bf16.mxu1 %v5256_v34 }
  0x93   : > { %1527 = vmatmul.mubr.bf16.gmra.mrb[24].mxu0 %v5203_v47 }
  0x94   : > { %1534 = vmatprep.mubr.bf16.mxu0 %v5297_v2 }
  0x95   : > { %1624 = vmatmul.mubr.bf16.gmra.mrb[24].mxu1 %v5295_v1 }
  0x96   : > { %1631 = vmatprep.mubr.bf16.mxu1 %v5302_v7 }
  0x9b   : > { %1535 = vmatmul.mubr.bf16.gmra.mrb[28].mxu0 %v5256_v34 }
  0x9c   : > { %1672 = vmatprep.mubr.bf16.mxu0 %v5048_v57  ;;  %v4463_v57 = vld [vmem:[%s5899_s1 + $0x210] sm:$0xff]  }
  0x9d   : > { %1632 = vmatmul.mubr.bf16.gmra.mrb[28].mxu1 %v5312_v10 }
  0x9e   : > { %1769 = vmatprep.mubr.bf16.mxu1 %v5078_v14 }
  0xa3   : > { %1673 = vmatmul.mubr.bf16.vlgmr.msra.gmra.mrb[32].mxu0 %v5024_v37  ;;  %v4465_v37 = vld [vmem:[#allocation2 + $0x8] sm:$0xff]  }
  0xa4   : > { %4245 = vmatpush3.bf16.msra.mxu0 %v4459_v0  ;;  %1680 = vmatprep.mubr.bf16.mxu0 %v5097_v29 }
  0xa5   : > { %1770 = vmatmul.mubr.bf16.vlgmr.msra.gmra.mrb[32].mxu1 %v5003_v23  ;;  %4246 = vmatprep.subr.bf16.mxu0 %v4460_v11  ;;  %v4466_v23 = vld [vmem:[%s5899_s1 + $0x218] sm:$0xff]  }
  0xa6   : > { %1777 = vmatprep.mubr.bf16.mxu1 %v5124_v50  ;;  %4123 = vmatpush3.bf16.msra.mxu1 %v4462_v12  ;;  %v4486_v12 = vld [vmem:[#allocation2 + $0x140] sm:$0xff]  }
  0xa7   : > { %4124 = vmatprep.subr.bf16.mxu1 %v4464_v13  ;;  %v5393_v13 = vld [vmem:[%s5386_s13 + $0x8] sm:$0xf] }
  0xa8   : > { %4247 = vmatpush3.bf16.msra.mxu0 %v4460_v11  ;;  %v1964_v20 = vshll.u32 %v5393_v13, 16 }
  0xa9   : > { %4248 = vmatprep.subr.bf16.mxu0 %v4463_v57 }
  0xaa   : > { %4125 = vmatpush3.bf16.msra.mxu1 %v4465_v37 }
  0xab   : > { %1681 = vmatmul.mubr.bf16.gmra.mrb[36].mxu0 %v5078_v14  ;;  %4126 = vmatprep.subr.bf16.mxu1 %v4467_v18  ;;  %v4473_v14 = vld [vmem:[#allocation2 + $0x60] sm:$0xff]   ;;  %v1961_v18 = vshrl.u32 %v5393_v13, 16 }
  0xac   : > { %1688 = vmatprep.mubr.bf16.mxu0 %v5140_v3  ;;  %4249 = vmatpush3.bf16.msra.mxu0 %v4463_v57 }
  0xad   : > { %1778 = vmatmul.mubr.bf16.gmra.mrb[36].mxu1 %v5054_v61  ;;  %4250 = vmatprep.subr.bf16.mxu0 %v4466_v23  ;;  %v4472_v61 = vld [vmem:[%s5899_s1 + $0x228] sm:$0xff]   ;;  %v1963_v19 = vrot.slane %v1961_v18, 4 }
  0xae   : > { %1785 = vmatprep.mubr.bf16.mxu1 %v5170_v21  ;;  %4127 = vmatpush3.bf16.msra.mxu1 %v4468_v25 }
  0xaf   : > { %4128 = vmatprep.subr.bf16.mxu1 %v4470_v27 }
  0xb0   : > { %4251 = vmatpush3.bf16.msra.mxu0 %v4466_v23  ;;  %v5414_v23 = vld [vmem:[%s5386_s13 + $0xc] sm:$0x1] }
  0xb1   : > { %4252 = vmatprep.subr.bf16.mxu0 %v4469_v32 }
  0xb2   : > { %4129 = vmatpush3.bf16.msra.mxu1 %v4471_v35  ;;  %v1966_v35 = vrot.slane %v1964_v20, 5 }
  0xb3   : > { %1689 = vmatmul.mubr.bf16.gmra.mrb[40].mxu0 %v5124_v50  ;;  %4130 = vmatprep.subr.bf16.mxu1 %v4473_v14  ;;  %v5366_v50 = vld [vmem:[%s4921_s15 + $0x6c] sm:$0xf]  ;;  %v706_v14 = vrot.slane %v704_v42, 4 }
  0xb4   : > { %1696 = vmatprep.mubr.bf16.mxu0 %v5189_v38  ;;  %4253 = vmatpush3.bf16.msra.mxu0 %v4469_v32  ;;  %v710_v58 = vshrl.u32 %v5366_v50, 16  ;;  %v713_v0 = vshll.u32 %v5366_v50, 16 }
  0xb5   : > { %1786 = vmatmul.mubr.bf16.gmra.mrb[40].mxu1 %v5101_v30  ;;  %4254 = vmatprep.subr.bf16.mxu0 %v4472_v61  ;;  %v5374_v30 = vld [vmem:[%s4921_s15 + $0x70] sm:$0xf]  ;;  %s4573_s15 = scalar_lea.vmem %s5836_s30, 2048 }
  0xb6   : > { %1793 = vmatprep.mubr.bf16.mxu1 %v5217_v63  ;;  %4131 = vmatpush3.bf16.msra.mxu1 %v4474_v41  ;;  %v719_v8 = vshll.u32 %v5374_v30, 16  ;;  %v723_v9 = vshrl.u32 %v5374_v30, 16  ;;  %v715_v11 = vrot.slane %v713_v0, 5  ;;  %p4574_p8 = scmp.ne.s32.totalorder %s5836_s30, %s4573_s15  ;;  %p4581_p5 = scmp.lt.s32.totalorder %s4579_s9, %s4573_s15 }
  0xb7   : > { %4132 = vmatprep.subr.bf16.mxu1 %v4476_v48  ;;  %v5427_v48 = vld [vmem:[%s5386_s13 + $0x10] sm:$0xf] }
  0xb8   : > { %4255 = vmatpush3.bf16.msra.mxu0 %v4472_v61  ;;  %v721_v16 = vrot.slane %v719_v8, 5  ;;  %v725_v57 = vrot.slane %v723_v9, 4  ;;  %v1970_v61 = vshll.u32 %v5414_v23, 16  ;;  %v1978_v0 = vshll.u32 %v5427_v48, 16  ;;  %v1939_v8 = vld [vmem:[%s5386_s13 + $0x14] sm:$0x1]  ;;  %p4575_p12 = pnand %p4574_p8, %p5926_p10  ;;  %p4582_p6 = por %p4581_p5, %p4580_p2 }
  0xb9   : > { %4256 = vmatprep.subr.bf16.mxu0 %v4475_v43  ;;  %v5454_v9 = vld [vmem:[%s5386_s13 + $0x1c] sm:$0x1] }
  0xba   : > { %4133 = vmatpush3.bf16.msra.mxu1 %v4477_v51  ;;  %v726_v26 = vor.u32 %v725_v57, %v721_v16  ;;  %v1998_v57 = vshll.u32 %v5454_v9, 16  ;;  %p4576_p0 = pneg %p4575_p12 }
  0xbb   : > { %1697 = vmatmul.mubr.bf16.gmra.mrb[44].mxu0 %v5170_v21  ;;  %4134 = vmatprep.subr.bf16.mxu1 %v4480_v52  ;;  %v712_v21 = vrot.slane %v710_v58, 4  ;;  %v1967_v52 = vor.u32 %v1966_v35, %v1963_v19  ;;  %v1972_v58 = vrot.slane %v1970_v61, 5  ;;  %v4488_v19 = vld [vmem:[#allocation2 + $0xc8] sm:$0xff]   ;;  %v2016_v35 = vrot.slane %v5414_v23, 5  ;;  %v4492_v23 = vld [vmem:[#allocation2 + $0xd0] sm:$0xff]  }
  0xbc   : > { %1704 = vmatprep.mubr.bf16.mxu0 %v5247_v28  ;;  %4257 = vmatpush3.bf16.msra.mxu0 %v4475_v43  ;;  %v727_v43 = vrot.slane %v726_v26, 4  ;;  %v3746_v61 = vrot.slane %v5393_v13, 9  ;;  %p4583_p7 = pnand %p4582_p6, %p4576_p0 }
  0xbd   : > { %1794 = vmatmul.mubr.bf16.gmra.mrb[44].mxu1 %v5144_v4  ;;  %4258 = vmatprep.subr.bf16.mxu0 %v4478_v55  ;;  %v5390_v4 = vld [vmem:[%s5386_s13] sm:$0xf]  ;;  %v716_v25 = vor.u32 %v715_v11, %v712_v21  ;;  %v1968_v6 = vrot.slane %v1967_v52, 4  ;;  %v1991_v11 = vrot.slane %v1989_v46, 4  ;;  %v4501_v46 = vld [vmem:[#allocation2 + $0x118] sm:$0xff]  }
  0xbe   : > { %1801 = vmatprep.mubr.bf16.mxu1 %v5252_v33  ;;  %4135 = vmatpush3.bf16.msra.mxu1 %v4481_v59  ;;  %v1947_v17 = vshrl.u32 %v5390_v4, 16  ;;  %v1950_v37 = vshll.u32 %v5390_v4, 16  ;;  %v1975_v59 = vshrl.u32 %v5427_v48, 16  ;;  %v5492_v52 = vsel %vm4969_vm5, %v3746_v61, %v2016_v35 }
  0xbf   : > { %4136 = vmatprep.subr.bf16.mxu1 %v4482_v5  ;;  %v717_v41 = vrot.slane %v716_v25, 4 }
  0xc0   : > { %4259 = vmatpush3.bf16.msra.mxu0 %v4478_v55  ;;  %v1949_v27 = vrot.slane %v1947_v17, 4  ;;  %v1952_v32 = vrot.slane %v1950_v37, 5  ;;  %v1958_v55 = vrot.slane %v1956_v36, 5  ;;  %v1977_v21 = vrot.slane %v1975_v59, 4  ;;  %v4491_v36 = vld [vmem:[#allocation2 + $0x148] sm:$0xff]   ;;  %v4499_v59 = vld [vmem:[#allocation2 + $0x158] sm:$0xff]  }
  0xc1   : > { %4150 = vmatprep.subr.bf16.mxu0 %v4484_v60  ;;  %v5464_v37 = vsel %vm4956_vm4, %v1968_v6, %v1972_v58 }
  0xc2   : > { %4137 = vmatpush3.bf16.msra.mxu1 %v4483_v56  ;;  %v1953_v51 = vor.u32 %v1952_v32, %v1949_v27  ;;  %v1980_v56 = vrot.slane %v1978_v0, 5  ;;  %v4498_v0 = vld [vmem:[#allocation2 + $0x98] sm:$0xff]  }
  0xc3   : > { %1705 = vmatmul.mubr.bf16.gmra.mrb[48].mxu0 %v5217_v63  ;;  %4178 = vmatprep.subr.bf16.mxu1 %v4486_v12  ;;  %v688_v63 = vsel %vm4956_vm4, %v5348_v39, %v5336_v31  ;;  %v707_v31 = vrot.slane %v5360_v49, 5 }
  0xc4   : > { %1712 = vmatprep.mubr.bf16.mxu0 %v5295_v1  ;;  %v3665_v39 = vcombine.low %v688_v63, %v698_v24  ;;  %v1954_v5 = vrot.slane %v1953_v51, 4  ;;  %v1981_v18 = vor.u32 %v1980_v56, %v1977_v21  ;;  %v4495_v51 = vld [vmem:[#allocation2 + $0x150] sm:$0xff]   ;;  %v5512_v21 = vld [vmem:[%s5386_s13 + $0x20] sm:$0xf]  ;;  %v4506_v56 = vld [vmem:[#allocation2 + $0xa8] sm:$0xff]  }
  0xc5   : > { %1802 = vmatmul.mubr.bf16.gmra.mrb[48].mxu1 %v5203_v47  ;;  %v729_v47 = vshll.u32 %v5396_v15, 16  ;;  %v708_v49 = vsel %vm4969_vm5, %v706_v14, %v707_v31  ;;  %v3751_v14 = vcombine.low %v5390_v4, %v5393_v13  ;;  %v4489_v31 = vld [vmem:[#allocation2 + $0x100] sm:$0xff]   ;;  %v3749_v35 = vrot.slane %v5512_v21, 9 }
  0xc6   : > { %1809 = vmatprep.mubr.bf16.mxu1 %v5297_v2  ;;  %v1959_v17 = vsel %vm4956_vm4, %v1954_v5, %v1958_v55  ;;  %v1982_v25 = vrot.slane %v1981_v18, 4  ;;  %v4497_v55 = vld [vmem:[#allocation2 + $0x110] sm:$0xff]   ;;  %v3639_v5 = vrot.slane %v5366_v50, 9 }
  0xc7   : > { %v731_v44 = vrot.slane %v729_v47, 5  ;;  %v3753_v63 = vcombine.low %v1959_v17, %v5464_v37  ;;  %v4485_v47 = vld [vmem:[#allocation2 + $0x80] sm:$0xff]   ;;  %v4512_v17 = vld [vmem:[#allocation2 + $0x170] sm:$0xff]  }
  0xc8   : > { %v4510_v18 = vld [vmem:[#allocation2 + $0xb0] sm:$0xff]  }
  0xc9   : > { %v732_v45 = vsel %vm4956_vm4, %v727_v43, %v731_v44  ;;  %v4490_v43 = vld [vmem:[#allocation2 + $0x88] sm:$0xff]  }
  0xca   : > { %v4493_v44 = vld [vmem:[#allocation2 + $0x108] sm:$0xff]  }
  0xcb   : > { %1713 = vmatmul.mubr.bf16.gmra.mrb[52].mxu0 %v5252_v33  ;;  %v705_v33 = vsel %vm4969_vm5, %v3638_v40, %v704_v42  ;;  %v1992_v40 = vshll.u32 %v5431_v54, 16 }
  0xcc   : > { %1720 = vmatprep.mubr.bf16.mxu0 %v5312_v10  ;;  %v5450_v42 = vcombine.low %v705_v33, %v708_v49  ;;  %v4494_v33 = vld [vmem:[#allocation2 + $0x90] sm:$0xff]   ;;  %v5500_v49 = vcombine.low %v5427_v48, %v5431_v54 }
  0xcd   : > { %1810 = vmatmul.mubr.bf16.gmra.mrb[52].mxu1 %v5256_v34  ;;  %v722_v34 = vsel %vm4956_vm4, %v717_v41, %v721_v16  ;;  %v1994_v12 = vrot.slane %v1992_v40, 5  ;;  %v1984_v16 = vshll.u32 %v1939_v8, 16  ;;  %v2020_v41 = vrot.slane %v1939_v8, 5  ;;  %v4503_v40 = vld [vmem:[#allocation2 + $0x160] sm:$0xff]  }
  0xce   : > { %1817 = vmatprep.mubr.bf16.mxu1 %v3665_v39  ;;  %v3668_v60 = vcombine.low %v722_v34, %v732_v45  ;;  %v738_v34 = vrot.slane %v5374_v30, 5  ;;  %v4500_v45 = vld [vmem:[#allocation2 + $0xe0] sm:$0xff]   ;;  %v741_v8 = vrot.slane %v5396_v15, 5 }
  0xcf   : > { %v1995_v20 = vor.u32 %v1994_v12, %v1991_v11  ;;  %v1986_v24 = vrot.slane %v1984_v16, 5  ;;  %v4508_v11 = vld [vmem:[#allocation2 + $0xf0] sm:$0xff]   ;;  %v4509_v12 = vld [vmem:[#allocation2 + $0x128] sm:$0xff]   ;;  %v2030_v16 = vshll.u32 %v5512_v21, 16 }
  0xd0   : > { %v740_v6 = vrot.slane %v738_v34, 4 }
  0xd1   : > { %v1996_v26 = vrot.slane %v1995_v20, 4  ;;  %v5472_v27 = vsel %vm4956_vm4, %v1982_v25, %v1986_v24  ;;  %v3757_v20 = vcombine.low %v5393_v13, %v5427_v48  ;;  %v4513_v24 = vld [vmem:[#allocation2 + $0xf8] sm:$0xff]  }
  0xd2   : > { %v742_v15 = vsel %vm4969_vm5, %v740_v6, %v741_v8  ;;  %v4515_v13 = vld [vmem:[#allocation2 + $0xb8] sm:$0xff]  }
  0xd3   : > { %1721 = vmatmul.mubr.bf16.gmra.mrb[56].mxu0 %v5297_v2  ;;  %v3667_v2 = vcombine.low %v5366_v50, %v5374_v30  ;;  %v4505_v30 = vld [vmem:[#allocation2 + $0x120] sm:$0xff]   ;;  %v739_v50 = vsel %vm4969_vm5, %v3639_v5, %v738_v34  ;;  %v4527_v34 = vld [vmem:[#allocation2 + $0x190] sm:$0xff]   ;;  %v4530_v5 = vld [vmem:[#allocation2 + $0x198] sm:$0xff]  }
  0xd4   : > { %1728 = vmatprep.mubr.bf16.mxu0 %v5450_v42 }
  0xd5   : > { %1818 = vmatmul.mubr.bf16.gmra.mrb[56].mxu1 %v5302_v7  ;;  %v2000_v7 = vrot.slane %v1998_v57, 5  ;;  %v3669_v57 = vcombine.low %v739_v50, %v742_v15  ;;  %v1945_v50 = vld [vmem:[%s5386_s13 + $0x2c] sm:$0x1] }
  0xd6   : > { %1825 = vmatprep.mubr.bf16.mxu1 %v3668_v60  ;;  %v4507_v60 = vld [vmem:[#allocation2 + $0x168] sm:$0xff]  }
  0xd7   : > { %v5476_v32 = vsel %vm4956_vm4, %v1996_v26, %v2000_v7  ;;  %v4514_v7 = vld [vmem:[#allocation2 + $0x130] sm:$0xff]   ;;  %v2032_v26 = vrot.slane %v2030_v16, 5  ;;  %v4536_v15 = vld [vmem:[#allocation2 + $0x1a8] sm:$0xff]  }
  0xd8   : > { %v4541_v16 = vld [vmem:[#allocation2 + $0x230] sm:$0xff]  }
  0xdb   : > { %1729 = vmatmul.mubr.bf16.gmra.mrb[60].mxu0 %v3665_v39  ;;  %v3747_v39 = vrot.slane %v5427_v48, 9  ;;  %v4519_v48 = vld [vmem:[#allocation2 + $0x1c0] sm:$0xff]  }
  0xdc   : > { %4260 = vmatprep.mubr.bf16.mxu0 %v5097_v29  ;;  %v5483_v29 = vcombine.low %v5472_v27, %v5476_v32 }
  0xdd   : > { %1826 = vmatmul.mubr.bf16.gmra.mrb[60].mxu1 %v3667_v2  ;;  %v3745_v2 = vrot.slane %v5390_v4, 9 }
  0xde   : > { %2729 = vmatprep.mubr.bf16.mxu1 %v3753_v63  ;;  %v1943_v63 = vld [vmem:[%s5386_s13 + $0x24] sm:$0x1] }
  0xdf   : > { %v2036_v61 = vshll.u32 %v1943_v63, 16 }
  0xe3   : > { %4261 = vmatmul.mubr.bf16.vlgmr.msra.gmra.mrb[64].mxu0 %v5140_v3  ;;  %v5496_v3 = vsel %vm4969_vm5, %v3747_v39, %v2020_v41  ;;  %v4522_v41 = vld [vmem:[#allocation2 + $0x200] sm:$0xff]  }
  0xe4   : > { %4151 = vmatpush3.bf16.msra.mxu0 %v4485_v47  ;;  %4264 = vmatprep.mubr.bf16.mxu0 %v5189_v38  ;;  %v4496_v38 = vld [vmem:[#allocation2 + $0xd8] sm:$0xff]   ;;  %v3761_v58 = vcombine.low %v5492_v52, %v5496_v3 }
  0xe5   : > { %2730 = vmatmul.mubr.bf16.vlgmr.msra.gmra.mrb[64].mxu1 %v3751_v14  ;;  %4152 = vmatprep.subr.bf16.mxu0 %v4488_v19  ;;  %v4516_v47 = vld [vmem:[#allocation2 + $0x178] sm:$0xff]   ;;  %v3748_v19 = vrot.slane %v5431_v54, 9  ;;  %v2044_v14 = vrot.slane %v1943_v63, 5 }
  0xe6   : > { %4179 = vmatpush3.bf16.msra.mxu1 %v4489_v31  ;;  %2737 = vmatprep.mubr.bf16.mxu1 %v5483_v29  ;;  %v4518_v31 = vld [vmem:[#allocation2 + $0x138] sm:$0xff]  }
  0xe7   : > { %4180 = vmatprep.subr.bf16.mxu1 %v4491_v36  ;;  %v4543_v63 = vld [vmem:[#allocation2 + $0x238] sm:$0xff]  }
  0xe8   : > { %4153 = vmatpush3.bf16.msra.mxu0 %v4490_v43  ;;  %v5536_v43 = vsel %vm4969_vm5, %v3749_v35, %v2044_v14 }
  0xe9   : > { %4154 = vmatprep.subr.bf16.mxu0 %v4492_v23  ;;  %v4520_v23 = vld [vmem:[#allocation2 + $0x180] sm:$0xff]  }
  0xea   : > { %4181 = vmatpush3.bf16.msra.mxu1 %v4493_v44  ;;  %v3758_v44 = vcombine.low %v5431_v54, %v5512_v21  ;;  %v4525_v54 = vld [vmem:[#allocation2 + $0x1d0] sm:$0xff]  }
  0xeb   : > { %4265 = vmatmul.mubr.bf16.gmra.mrb[68].mxu0 %v5247_v28  ;;  %4182 = vmatprep.subr.bf16.mxu1 %v4495_v51  ;;  %v4502_v28 = vld [vmem:[#allocation2 + $0xa0] sm:$0xff]   ;;  %v3759_v51 = vcombine.low %v5464_v37, %v5472_v27 }
  0xec   : > { %4155 = vmatpush3.bf16.msra.mxu0 %v4494_v33  ;;  %4268 = vmatprep.mubr.bf16.mxu0 %v5295_v1  ;;  %v4504_v1 = vld [vmem:[#allocation2 + $0xe8] sm:$0xff]  }
  0xed   : > { %4156 = vmatprep.subr.bf16.mxu0 %v4496_v38  ;;  %2738 = vmatmul.mubr.bf16.gmra.mrb[68].mxu1 %v5500_v49  ;;  %v4521_v33 = vld [vmem:[#allocation2 + $0x1c8] sm:$0xff]  }
  0xee   : > { %4183 = vmatpush3.bf16.msra.mxu1 %v4497_v55  ;;  %2827 = vmatprep.mubr.bf16.mxu1 %v3761_v58  ;;  %v2038_v55 = vrot.slane %v2036_v61, 5  ;;  %v4526_v58 = vld [vmem:[#allocation2 + $0x208] sm:$0xff]  }
  0xef   : > { %4184 = vmatprep.subr.bf16.mxu1 %v4499_v59  ;;  %v4523_v59 = vld [vmem:[#allocation2 + $0x188] sm:$0xff]  }
  0xf0   : > { %4157 = vmatpush3.bf16.msra.mxu0 %v4498_v0  ;;  %v4529_v0 = vld [vmem:[#allocation2 + $0x210] sm:$0xff]  }
  0xf1   : > { %4158 = vmatprep.subr.bf16.mxu0 %v4500_v45 }
  0xf2   : > { %4185 = vmatpush3.bf16.msra.mxu1 %v4501_v46  ;;  %v4528_v46 = vld [vmem:[#allocation2 + $0x1d8] sm:$0xff]  }
  0xf3   : > { %4269 = vmatmul.mubr.bf16.gmra.mrb[72].mxu0 %v5312_v10  ;;  %4186 = vmatprep.subr.bf16.mxu1 %v4503_v40  ;;  %v2027_v10 = vshrl.u32 %v5512_v21, 16  ;;  %v1944_v40 = vld [vmem:[%s5386_s13 + $0x28] sm:$0xf]  ;;  %s5846_s13 = scalar_lea.sflag [#allocation4], %s337_s18 }
  0xf4   : > { %4159 = vmatpush3.bf16.msra.mxu0 %v4502_v28  ;;  %4272 = vmatprep.mubr.bf16.mxu0 %v5450_v42  ;;  %v2012_v42 = vrot.slane %v5406_v22, 5  ;;  %v2024_v22 = vrot.slane %v5454_v9, 5  ;;  %v4532_v28 = vld [vmem:[#allocation2 + $0x218] sm:$0xff]   ;;  %v2047_v6 = vshrl.u32 %v1944_v40, 16  ;;  %v2050_v8 = vshll.u32 %v1944_v40, 16 }
  0xf5   : > { %4160 = vmatprep.subr.bf16.mxu0 %v4504_v1  ;;  %v2029_v25 = vrot.slane %v2027_v10, 4  ;;  %v4533_v1 = vld [vmem:[#allocation2 + $0x1a0] sm:$0xff]   ;;  %v2056_v10 = vshll.u32 %v1945_v50, 16 }
  0xf6   : > { %4187 = vmatpush3.bf16.msra.mxu1 %v4505_v30  ;;  %v2013_v4 = vsel %vm4969_vm5, %v3745_v2, %v2012_v42  ;;  %v2025_v9 = vsel %vm4969_vm5, %v3748_v19, %v2024_v22  ;;  %v4534_v30 = vld [vmem:[#allocation2 + $0x1e8] sm:$0xff]   ;;  %v2064_v2 = vrot.slane %v1945_v50, 5  ;;  %v3763_v19 = vcombine.low %v5512_v21, %v1944_v40 }
  0xf7   : > { %4188 = vmatprep.subr.bf16.mxu1 %v4507_v60  ;;  %v2033_v36 = vor.u32 %v2032_v26, %v2029_v25  ;;  %v3755_v39 = vcombine.low %v2013_v4, %v5492_v52  ;;  %v3762_v52 = vcombine.low %v2025_v9, %v5536_v43  ;;  %v3756_v27 = vcombine.low %v5496_v3, %v2025_v9  ;;  %v4531_v3 = vld [vmem:[#allocation2 + $0x1e0] sm:$0xff]  }
  0xf8   : > { %4161 = vmatpush3.bf16.msra.mxu0 %v4506_v56  ;;  %v2049_v60 = vrot.slane %v2047_v6, 4  ;;  %v2052_v56 = vrot.slane %v2050_v8, 5 }
  0xf9   : > { %4162 = vmatprep.subr.bf16.mxu0 %v4508_v11  ;;  %v2034_v38 = vrot.slane %v2033_v36, 4  ;;  %v4537_v11 = vld [vmem:[#allocation2 + $0x1f0] sm:$0xff]  }
  0xfa   : > { %4189 = vmatpush3.bf16.msra.mxu1 %v4509_v12  ;;  %v2053_v12 = vor.u32 %v2052_v56, %v2049_v60 }
  0xfb   : > { %4273 = vmatmul.mubr.bf16.gmra.mrb[76].mxu0 %v3669_v57  ;;  %4190 = vmatprep.subr.bf16.mxu1 %v4512_v17  ;;  %v5545_v37 = vsel %vm4956_vm4, %v2034_v38, %v2038_v55  ;;  %v4539_v57 = vld [vmem:[#allocation2 + $0x1b0] sm:$0xff]   ;;  %v4540_v17 = vld [vmem:[#allocation2 + $0x1f8] sm:$0xff]  }
  0xfc   : > { %4163 = vmatpush3.bf16.msra.mxu0 %v4510_v18  ;;  %2778 = vmatprep.mubr.bf16.mxu0 %v3757_v20  ;;  %v3760_v45 = vcombine.low %v5476_v32, %v5545_v37  ;;  %v4535_v32 = vld [vmem:[#allocation2 + $0x220] sm:$0xff]   ;;  %v2054_v42 = vrot.slane %v2053_v12, 4  ;;  %v2058_v18 = vrot.slane %v2056_v10, 5  ;;  %v3750_v20 = vrot.slane %v1944_v40, 9 }
  0xfd   : > { %4164 = vmatprep.subr.bf16.mxu0 %v4513_v24  ;;  %v4542_v24 = vld [vmem:[#allocation2 + $0x1b8] sm:$0xff]  }
  0xfe   : > { %4191 = vmatpush3.bf16.msra.mxu1 %v4514_v7  ;;  %v2059_v7 = vsel %vm4956_vm4, %v2054_v42, %v2058_v18  ;;  %v2065_v25 = vsel %vm4969_vm5, %v3750_v20, %v2064_v2 }
  0xff   : > { %4192 = vmatprep.subr.bf16.mxu1 %v4516_v47  ;;  %v3764_v26 = vcombine.low %v5545_v37, %v2059_v7  ;;  %v3765_v47 = vcombine.low %v5536_v43, %v2065_v25 }
 0x100   : > { %4165 = vmatpush3.bf16.msra.mxu0 %v4515_v13 }
 0x101   : > { %4206 = vmatprep.subr.bf16.mxu0 %v4519_v48 }
 0x102   : > { %4193 = vmatpush3.bf16.msra.mxu1 %v4518_v31 }
 0x103   : > { %2779 = vmatmul.mubr.bf16.vlgmr.msra.gmra.mrb[80].mxu0 %v3755_v39  ;;  %4276 = vmatprep.subr.bf16.mxu1 %v4522_v41 }
 0x104   : > { %4207 = vmatpush3.bf16.msra.mxu0 %v4520_v23  ;;  %2786 = vmatprep.mubr.bf16.mxu0 %v3758_v44 }
 0x105   : > { %2828 = vmatmul.mubr.bf16.vlgmr.msra.gmra.mrb[72].mxu1 %v3759_v51  ;;  %4208 = vmatprep.subr.bf16.mxu0 %v4521_v33 }
 0x106   : > { %4277 = vmatpush3.bf16.msra.mxu1 %v4522_v41  ;;  %2835 = vmatprep.mubr.bf16.mxu1 %v3762_v52 }
 0x107   : > { %4278 = vmatprep.subr.bf16.mxu1 %v4526_v58 }
 0x108   : > { %4209 = vmatpush3.bf16.msra.mxu0 %v4523_v59 }
 0x109   : > { %4210 = vmatprep.subr.bf16.mxu0 %v4525_v54 }
 0x10a   : > { %4279 = vmatpush3.bf16.msra.mxu1 %v4526_v58 }
 0x10b   : > { %2787 = vmatmul.mubr.bf16.gmra.mrb[84].mxu0 %v3756_v27  ;;  %4280 = vmatprep.subr.bf16.mxu1 %v4529_v0 }
 0x10c   : > { %4211 = vmatpush3.bf16.msra.mxu0 %v4527_v34  ;;  %2876 = vmatprep.mubr.bf16.mxu0 %v5483_v29  ;;  %v4538_v29 = vld [vmem:[#allocation2 + $0x228] sm:$0xff]  }
 0x10d   : > { %2836 = vmatmul.mubr.bf16.gmra.mrb[76].mxu1 %v3760_v45  ;;  %4212 = vmatprep.subr.bf16.mxu0 %v4528_v46 }
 0x10e   : > { %4281 = vmatpush3.bf16.msra.mxu1 %v4529_v0  ;;  %4292 = vmatprep.mubr.bf16.mxu1 %v3756_v27 }
 0x10f   : > { %4282 = vmatprep.subr.bf16.mxu1 %v4532_v28 }
 0x110   : > { %4213 = vmatpush3.bf16.msra.mxu0 %v4530_v5 }
 0x111   : > { %4214 = vmatprep.subr.bf16.mxu0 %v4531_v3 }
 0x112   : > { %4283 = vmatpush3.bf16.msra.mxu1 %v4532_v28 }
 0x113   : > { %4284 = vmatprep.subr.bf16.mxu1 %v4535_v32 }
 0x114   : > { %4215 = vmatpush3.bf16.msra.mxu0 %v4533_v1 }
 0x115   : > { %4216 = vmatprep.subr.bf16.mxu0 %v4534_v30 }
 0x116   : > { %4285 = vmatpush3.bf16.msra.mxu1 %v4535_v32 }
 0x117   : > { %4286 = vmatprep.subr.bf16.mxu1 %v4538_v29 }
 0x118   : > { %4217 = vmatpush3.bf16.msra.mxu0 %v4536_v15 }
 0x119   : > { %4218 = vmatprep.subr.bf16.mxu0 %v4537_v11 }
 0x11a   : > { %4287 = vmatpush3.bf16.msra.mxu1 %v4538_v29 }
 0x11b   : > { %4288 = vmatprep.subr.bf16.mxu1 %v4541_v16 }
 0x11c   : > { %4219 = vmatpush3.bf16.msra.mxu0 %v4539_v57 }
 0x11d   : > { %4220 = vmatprep.subr.bf16.mxu0 %v4540_v17 }
 0x11e   : > { %4289 = vmatpush3.bf16.msra.mxu1 %v4541_v16 }
 0x11f   : > { %4290 = vmatprep.subr.bf16.mxu1 %v4543_v63 }
 0x120   : > { %4221 = vmatpush3.bf16.msra.mxu0 %v4542_v24 }
 0x122   : > { %4291 = vmatpush3.bf16.msra.mxu1 %v4543_v63 }
 0x123   : > { %2877 = vmatmul.mubr.bf16.vlgmr.msra.gmra.mrb[88].mxu0 %v5500_v49 }
 0x124   : > { %2884 = vmatprep.mubr.bf16.mxu0 %v3764_v26 }
 0x125   : > { %4293 = vmatmul.mubr.bf16.vlgmr.msra.gmra.mrb[80].mxu1 %v3765_v47 }
 0x12b   : > { %2885 = vmatmul.mubr.bf16.gmra.mrb[92].mxu0 %v3763_v19 }
 0x136   : > { %v3866_v53 = vpop.f32.mrb[0].mxu0 }
 0x137   : > { %v3867_v22 = vpop.f32.mrb[1].mxu0 }
 0x138   : > { %v3868_v35 = vadd.f32 %v3867_v22, %v3866_v53  ;;  %v3869_v14 = vpop.f32.mrb[2].mxu0  ;;  %v3930_v13 = vpop.f32.mrb[0].mxu1 }
 0x139   : > { %v3870_v4 = vpop.f32.mrb[3].mxu0  ;;  %v3931_v48 = vpop.f32.mrb[1].mxu1 }
 0x13a   : > { %v1481_v31 = vadd.f32 %v3868_v35, %v5564_v62  ;;  %v3871_v49 = vadd.f32 %v3870_v4, %v3869_v14  ;;  %v3932_v36 = vadd.f32 %v3931_v48, %v3930_v13  ;;  %v3933_v61 = vpop.f32.mrb[2].mxu1 }
 0x13b   : > { %v3934_v39 = vpop.f32.mrb[3].mxu1 }
 0x13c   : > { %v1484_v21 = vadd.f32 %v3871_v49, %v5564_v62  ;;  %v5568_v41 = vadd.f32 %v3932_v36, %v1481_v31  ;;  %v3935_v9 = vadd.f32 %v3934_v39, %v3933_v61 }
 0x13e   : > { %v5570_v43 = vadd.f32 %v3935_v9, %v1484_v21  ;;  %v3872_v23 = vpop.f32.mrb[4].mxu0 }
 0x13f   : > { %v3873_v44 = vpop.f32.mrb[5].mxu0 }
 0x140   : > { %v3874_v51 = vadd.f32 %v3873_v44, %v3872_v23  ;;  %v3875_v33 = vpop.f32.mrb[6].mxu0  ;;  %v3936_v52 = vpop.f32.mrb[4].mxu1 }
 0x141   : > { %v3876_v38 = vpop.f32.mrb[7].mxu0  ;;  %v3937_v55 = vpop.f32.mrb[5].mxu1 }
 0x142   : > { %v1489_v58 = vadd.f32 %v3874_v51, %v5564_v62  ;;  %v3877_v59 = vadd.f32 %v3876_v38, %v3875_v33  ;;  %v3938_v54 = vadd.f32 %v3937_v55, %v3936_v52  ;;  %v3939_v37 = vpop.f32.mrb[6].mxu1 }
 0x143   : > { %v3940_v27 = vpop.f32.mrb[7].mxu1 }
 0x144   : > { %v1492_v0 = vadd.f32 %v3877_v59, %v5564_v62  ;;  %v5574_v34 = vadd.f32 %v3938_v54, %v1489_v58  ;;  %v3941_v45 = vadd.f32 %v3940_v27, %v3939_v37 }
 0x146   : > { %v5576_v46 = vadd.f32 %v3941_v45, %v1492_v0  ;;  %v3878_v40 = vpop.f32.mrb[8].mxu0 }
 0x147   : > { %v3879_v28 = vpop.f32.mrb[9].mxu0 }
 0x148   : > { %v3880_v5 = vadd.f32 %v3879_v28, %v3878_v40  ;;  %v3881_v3 = vpop.f32.mrb[10].mxu0  ;;  %v3942_v6 = vpop.f32.mrb[8].mxu1 }
 0x149   : > { %v3882_v8 = vpop.f32.mrb[11].mxu0  ;;  %v3943_v32 = vpop.f32.mrb[9].mxu1 }
 0x14a   : > { %v1497_v1 = vadd.f32 %v3880_v5, %v5564_v62  ;;  %v3883_v30 = vadd.f32 %v3882_v8, %v3881_v3  ;;  %v3944_v60 = vadd.f32 %v3943_v32, %v3942_v6  ;;  %v3945_v56 = vpop.f32.mrb[10].mxu1 }
 0x14b   : > { %v3946_v50 = vpop.f32.mrb[11].mxu1 }
 0x14c   : > { %v1500_v29 = vadd.f32 %v3883_v30, %v5564_v62  ;;  %v5580_v15 = vadd.f32 %v3944_v60, %v1497_v1  ;;  %v3947_v11 = vadd.f32 %v3946_v50, %v3945_v56 }
 0x14e   : > { %v5582_v12 = vadd.f32 %v3947_v11, %v1500_v29  ;;  %v3884_v10 = vpop.f32.mrb[12].mxu0 }
 0x14f   : > { %v3885_v16 = vpop.f32.mrb[13].mxu0 }
 0x150   : > { %v3886_v57 = vadd.f32 %v3885_v16, %v3884_v10  ;;  %v3887_v17 = vpop.f32.mrb[14].mxu0  ;;  %v3948_v42 = vpop.f32.mrb[12].mxu1 }
 0x151   : > { %v3888_v18 = vpop.f32.mrb[15].mxu0  ;;  %v3949_v20 = vpop.f32.mrb[13].mxu1 }
 0x152   : > { %v1505_v2 = vadd.f32 %v3886_v57, %v5564_v62  ;;  %v3889_v63 = vadd.f32 %v3888_v18, %v3887_v17  ;;  %v3950_v24 = vadd.f32 %v3949_v20, %v3948_v42  ;;  %v3951_v7 = vpop.f32.mrb[14].mxu1 }
 0x153   : > { %v3952_v25 = vpop.f32.mrb[15].mxu1 }
 0x154   : > { %v1508_v26 = vadd.f32 %v3889_v63, %v5564_v62  ;;  %v5586_v47 = vadd.f32 %v3950_v24, %v1505_v2  ;;  %v3953_v19 = vadd.f32 %v3952_v25, %v3951_v7 }
 0x156   : > { %v5588_v53 = vadd.f32 %v3953_v19, %v1508_v26  ;;  %v3890_v22 = vpop.f32.mrb[16].mxu0 }
 0x157   : > { %v3891_v35 = vpop.f32.mrb[17].mxu0 }
 0x158   : > { %v3892_v14 = vadd.f32 %v3891_v35, %v3890_v22  ;;  %v3893_v13 = vpop.f32.mrb[18].mxu0  ;;  %v3954_v4 = vpop.f32.mrb[16].mxu1 }
 0x159   : > { %v3894_v48 = vpop.f32.mrb[19].mxu0  ;;  %v3955_v31 = vpop.f32.mrb[17].mxu1 }
 0x15a   : > { %v1513_v49 = vadd.f32 %v3892_v14, %v5564_v62  ;;  %v3895_v36 = vadd.f32 %v3894_v48, %v3893_v13  ;;  %v3956_v61 = vadd.f32 %v3955_v31, %v3954_v4  ;;  %v3957_v39 = vpop.f32.mrb[18].mxu1 }
 0x15b   : > { %v3958_v21 = vpop.f32.mrb[19].mxu1 }
 0x15c   : > { %v1516_v9 = vadd.f32 %v3895_v36, %v5564_v62  ;;  %v5592_v23 = vadd.f32 %v3956_v61, %v1513_v49  ;;  %v3959_v44 = vadd.f32 %v3958_v21, %v3957_v39 }
 0x15e   : > { %v5594_v51 = vadd.f32 %v3959_v44, %v1516_v9  ;;  %v3896_v33 = vpop.f32.mrb[20].mxu0 }
 0x15f   : > { %v3897_v52 = vpop.f32.mrb[21].mxu0 }
 0x160   : > { %v3898_v38 = vadd.f32 %v3897_v52, %v3896_v33  ;;  %v3899_v55 = vpop.f32.mrb[22].mxu0  ;;  %v3960_v58 = vpop.f32.mrb[20].mxu1 }
 0x161   : > { %v3900_v59 = vpop.f32.mrb[23].mxu0  ;;  %v3961_v54 = vpop.f32.mrb[21].mxu1 }
 0x162   : > { %v1521_v37 = vadd.f32 %v3898_v38, %v5564_v62  ;;  %v3901_v27 = vadd.f32 %v3900_v59, %v3899_v55  ;;  %v3962_v0 = vadd.f32 %v3961_v54, %v3960_v58  ;;  %v3963_v45 = vpop.f32.mrb[22].mxu1 }
 0x163   : > { %v3964_v40 = vpop.f32.mrb[23].mxu1 }
 0x164   : > { %v1524_v28 = vadd.f32 %v3901_v27, %v5564_v62  ;;  %v5598_v5 = vadd.f32 %v3962_v0, %v1521_v37  ;;  %v3965_v3 = vadd.f32 %v3964_v40, %v3963_v45 }
 0x166   : > { %v5600_v6 = vadd.f32 %v3965_v3, %v1524_v28  ;;  %v3902_v8 = vpop.f32.mrb[24].mxu0 }
 0x167   : > { %v3903_v32 = vpop.f32.mrb[25].mxu0 }
 0x168   : > { %v3904_v1 = vadd.f32 %v3903_v32, %v3902_v8  ;;  %v3905_v30 = vpop.f32.mrb[26].mxu0  ;;  %v3966_v60 = vpop.f32.mrb[24].mxu1 }
 0x169   : > { %v3906_v56 = vpop.f32.mrb[27].mxu0  ;;  %v3967_v50 = vpop.f32.mrb[25].mxu1 }
 0x16a   : > { %v1529_v29 = vadd.f32 %v3904_v1, %v5564_v62  ;;  %v3907_v11 = vadd.f32 %v3906_v56, %v3905_v30  ;;  %v3968_v10 = vadd.f32 %v3967_v50, %v3966_v60  ;;  %v3969_v16 = vpop.f32.mrb[26].mxu1 }
 0x16b   : > { %v3970_v57 = vpop.f32.mrb[27].mxu1 }
 0x16c   : > { %v1532_v17 = vadd.f32 %v3907_v11, %v5564_v62  ;;  %v5604_v42 = vadd.f32 %v3968_v10, %v1529_v29  ;;  %v3971_v18 = vadd.f32 %v3970_v57, %v3969_v16 }
 0x16e   : > { %v5606_v20 = vadd.f32 %v3971_v18, %v1532_v17  ;;  %v3908_v2 = vpop.f32.mrb[28].mxu0 }
 0x16f   : > { %v3909_v63 = vpop.f32.mrb[29].mxu0 }
 0x170   : > { %v3910_v24 = vadd.f32 %v3909_v63, %v3908_v2  ;;  %v3911_v7 = vpop.f32.mrb[30].mxu0  ;;  %v3972_v25 = vpop.f32.mrb[28].mxu1 }
 0x171   : > { %v3912_v26 = vpop.f32.mrb[31].mxu0  ;;  %v3973_v19 = vpop.f32.mrb[29].mxu1 }
 0x172   : > { %v1537_v22 = vadd.f32 %v3910_v24, %v5564_v62  ;;  %v3913_v35 = vadd.f32 %v3912_v26, %v3911_v7  ;;  %v3974_v14 = vadd.f32 %v3973_v19, %v3972_v25  ;;  %v3975_v13 = vpop.f32.mrb[30].mxu1 }
 0x173   : > { %v3976_v4 = vpop.f32.mrb[31].mxu1 }
 0x174   : > { %v1540_v48 = vadd.f32 %v3913_v35, %v5564_v62  ;;  %v5610_v31 = vadd.f32 %v3974_v14, %v1537_v22  ;;  %v3977_v49 = vadd.f32 %v3976_v4, %v3975_v13 }
 0x176   : > { %v5612_v36 = vadd.f32 %v3977_v49, %v1540_v48  ;;  %v3994_v61 = vpop.f32.mrb[32].mxu0 }
 0x177   : > { %v3995_v39 = vpop.f32.mrb[33].mxu0 }
 0x178   : > { %v3996_v21 = vadd.f32 %v3995_v39, %v3994_v61  ;;  %v3997_v9 = vpop.f32.mrb[34].mxu0  ;;  %v4058_v44 = vpop.f32.mrb[32].mxu1 }
 0x179   : > { %v3998_v33 = vpop.f32.mrb[35].mxu0  ;;  %v4059_v52 = vpop.f32.mrb[33].mxu1 }
 0x17a   : > { %v1675_v38 = vadd.f32 %v3996_v21, %v5568_v41  ;;  %v3999_v55 = vadd.f32 %v3998_v33, %v3997_v9  ;;  %v4060_v58 = vadd.f32 %v4059_v52, %v4058_v44  ;;  %v4061_v59 = vpop.f32.mrb[34].mxu1 }
 0x17b   : > { %v4062_v54 = vpop.f32.mrb[35].mxu1 }
 0x17c   : > { %v1678_v62 = vadd.f32 %v3999_v55, %v5570_v43  ;;  %v4063_v37 = vadd.f32 %v4062_v54, %v4061_v59  ;;  %v5616_v27 = vadd.f32 %v4060_v58, %v1675_v38 }
 0x17e   : > { %v4000_v0 = vpop.f32.mrb[36].mxu0  ;;  %v5618_v45 = vadd.f32 %v4063_v37, %v1678_v62 }
 0x17f   : > { %v4001_v40 = vpop.f32.mrb[37].mxu0 }
 0x180   : > { %v4002_v28 = vadd.f32 %v4001_v40, %v4000_v0  ;;  %v4003_v3 = vpop.f32.mrb[38].mxu0  ;;  %v4064_v8 = vpop.f32.mrb[36].mxu1 }
 0x181   : > { %v4004_v32 = vpop.f32.mrb[39].mxu0  ;;  %v4065_v1 = vpop.f32.mrb[37].mxu1 }
 0x182   : > { %v1683_v41 = vadd.f32 %v4002_v28, %v5574_v34  ;;  %v4005_v30 = vadd.f32 %v4004_v32, %v4003_v3  ;;  %v4066_v60 = vadd.f32 %v4065_v1, %v4064_v8  ;;  %v4067_v56 = vpop.f32.mrb[38].mxu1 }
 0x183   : > { %v4068_v50 = vpop.f32.mrb[39].mxu1 }
 0x184   : > { %v1686_v43 = vadd.f32 %v4005_v30, %v5576_v46  ;;  %v4069_v29 = vadd.f32 %v4068_v50, %v4067_v56  ;;  %v5622_v11 = vadd.f32 %v4066_v60, %v1683_v41 }
 0x186   : > { %v4006_v10 = vpop.f32.mrb[40].mxu0  ;;  %v5624_v16 = vadd.f32 %v4069_v29, %v1686_v43 }
 0x187   : > { %v4007_v57 = vpop.f32.mrb[41].mxu0 }
 0x188   : > { %v4008_v17 = vadd.f32 %v4007_v57, %v4006_v10  ;;  %v4009_v18 = vpop.f32.mrb[42].mxu0  ;;  %v4070_v2 = vpop.f32.mrb[40].mxu1 }
 0x189   : > { %v4010_v63 = vpop.f32.mrb[43].mxu0  ;;  %v4071_v24 = vpop.f32.mrb[41].mxu1 }
 0x18a   : > { %v1691_v34 = vadd.f32 %v4008_v17, %v5580_v15  ;;  %v4011_v7 = vadd.f32 %v4010_v63, %v4009_v18  ;;  %v4072_v25 = vadd.f32 %v4071_v24, %v4070_v2  ;;  %v4073_v26 = vpop.f32.mrb[42].mxu1 }
 0x18b   : > { %v4074_v19 = vpop.f32.mrb[43].mxu1 }
 0x18c   : > { %v1694_v46 = vadd.f32 %v4011_v7, %v5582_v12  ;;  %v4075_v22 = vadd.f32 %v4074_v19, %v4073_v26  ;;  %v5628_v35 = vadd.f32 %v4072_v25, %v1691_v34 }
 0x18e   : > { %v4012_v14 = vpop.f32.mrb[44].mxu0  ;;  %v5630_v13 = vadd.f32 %v4075_v22, %v1694_v46 }
 0x18f   : > { %v4013_v4 = vpop.f32.mrb[45].mxu0 }
 0x190   : > { %v4014_v48 = vadd.f32 %v4013_v4, %v4012_v14  ;;  %v4015_v49 = vpop.f32.mrb[46].mxu0  ;;  %v4076_v61 = vpop.f32.mrb[44].mxu1 }
 0x191   : > { %v4016_v39 = vpop.f32.mrb[47].mxu0  ;;  %v4077_v21 = vpop.f32.mrb[45].mxu1 }
 0x192   : > { %v1699_v15 = vadd.f32 %v4014_v48, %v5586_v47  ;;  %v4017_v9 = vadd.f32 %v4016_v39, %v4015_v49  ;;  %v4078_v44 = vadd.f32 %v4077_v21, %v4076_v61  ;;  %v4079_v33 = vpop.f32.mrb[46].mxu1 }
 0x193   : > { %v4080_v52 = vpop.f32.mrb[47].mxu1 }
 0x194   : > { %v1702_v12 = vadd.f32 %v4017_v9, %v5588_v53  ;;  %v4081_v38 = vadd.f32 %v4080_v52, %v4079_v33  ;;  %v5634_v55 = vadd.f32 %v4078_v44, %v1699_v15 }
 0x196   : > { %v4018_v58 = vpop.f32.mrb[48].mxu0  ;;  %v5636_v59 = vadd.f32 %v4081_v38, %v1702_v12 }
 0x197   : > { %v4019_v54 = vpop.f32.mrb[49].mxu0 }
 0x198   : > { %v4020_v62 = vadd.f32 %v4019_v54, %v4018_v58  ;;  %v4021_v37 = vpop.f32.mrb[50].mxu0  ;;  %v4082_v0 = vpop.f32.mrb[48].mxu1 }
 0x199   : > { %v4022_v40 = vpop.f32.mrb[51].mxu0  ;;  %v4083_v28 = vpop.f32.mrb[49].mxu1 }
 0x19a   : > { %v1707_v47 = vadd.f32 %v4020_v62, %v5592_v23  ;;  %v4023_v3 = vadd.f32 %v4022_v40, %v4021_v37  ;;  %v4084_v8 = vadd.f32 %v4083_v28, %v4082_v0  ;;  %v4085_v32 = vpop.f32.mrb[50].mxu1 }
 0x19b   : > { %v4086_v1 = vpop.f32.mrb[51].mxu1 }
 0x19c   : > { %v1710_v53 = vadd.f32 %v4023_v3, %v5594_v51  ;;  %v4087_v41 = vadd.f32 %v4086_v1, %v4085_v32  ;;  %v5640_v30 = vadd.f32 %v4084_v8, %v1707_v47 }
 0x19e   : > { %v4024_v60 = vpop.f32.mrb[52].mxu0  ;;  %v5642_v56 = vadd.f32 %v4087_v41, %v1710_v53 }
 0x19f   : > { %v4025_v50 = vpop.f32.mrb[53].mxu0 }
 0x1a0   : > { %v4026_v43 = vadd.f32 %v4025_v50, %v4024_v60  ;;  %v4027_v29 = vpop.f32.mrb[54].mxu0  ;;  %v4088_v10 = vpop.f32.mrb[52].mxu1 }
 0x1a1   : > { %v4028_v57 = vpop.f32.mrb[55].mxu0  ;;  %v4089_v17 = vpop.f32.mrb[53].mxu1 }
 0x1a2   : > { %v1715_v23 = vadd.f32 %v4026_v43, %v5598_v5  ;;  %v4029_v18 = vadd.f32 %v4028_v57, %v4027_v29  ;;  %v4090_v2 = vadd.f32 %v4089_v17, %v4088_v10  ;;  %v4091_v63 = vpop.f32.mrb[54].mxu1 }
 0x1a3   : > { %v4092_v24 = vpop.f32.mrb[55].mxu1 }
 0x1a4   : > { %v1718_v51 = vadd.f32 %v4029_v18, %v5600_v6  ;;  %v4093_v34 = vadd.f32 %v4092_v24, %v4091_v63  ;;  %v5646_v7 = vadd.f32 %v4090_v2, %v1715_v23 }
 0x1a6   : > { %v4030_v25 = vpop.f32.mrb[56].mxu0  ;;  %v5648_v26 = vadd.f32 %v4093_v34, %v1718_v51 }
 0x1a7   : > { %v4031_v19 = vpop.f32.mrb[57].mxu0 }
 0x1a8   : > { %v4032_v46 = vadd.f32 %v4031_v19, %v4030_v25  ;;  %v4033_v22 = vpop.f32.mrb[58].mxu0  ;;  %v4094_v14 = vpop.f32.mrb[56].mxu1 }
 0x1a9   : > { %v4034_v4 = vpop.f32.mrb[59].mxu0  ;;  %v4095_v48 = vpop.f32.mrb[57].mxu1 }
 0x1aa   : > { %v1723_v5 = vadd.f32 %v4032_v46, %v5604_v42  ;;  %v4035_v49 = vadd.f32 %v4034_v4, %v4033_v22  ;;  %v4096_v61 = vadd.f32 %v4095_v48, %v4094_v14  ;;  %v4097_v39 = vpop.f32.mrb[58].mxu1 }
 0x1ab   : > { %v4098_v21 = vpop.f32.mrb[59].mxu1 }
 0x1ac   : > { %v1726_v6 = vadd.f32 %v4035_v49, %v5606_v20  ;;  %v4099_v15 = vadd.f32 %v4098_v21, %v4097_v39  ;;  %v1820_v9 = vadd.f32 %v4096_v61, %v1723_v5 }
 0x1ae   : > { %v4036_v44 = vpop.f32.mrb[60].mxu0  ;;  %v1823_v33 = vadd.f32 %v4099_v15, %v1726_v6 }
 0x1af   : > { %v4037_v52 = vpop.f32.mrb[61].mxu0 }
 0x1b0   : > { %v4038_v12 = vadd.f32 %v4037_v52, %v4036_v44  ;;  %v4039_v38 = vpop.f32.mrb[62].mxu0  ;;  %v4100_v58 = vpop.f32.mrb[60].mxu1 }
 0x1b1   : > { %v4040_v54 = vpop.f32.mrb[63].mxu0  ;;  %v4101_v62 = vpop.f32.mrb[61].mxu1 }
 0x1b2   : > { %v1731_v37 = vadd.f32 %v4038_v12, %v5610_v31  ;;  %v4041_v0 = vadd.f32 %v4040_v54, %v4039_v38  ;;  %v4102_v42 = vadd.f32 %v4101_v62, %v4100_v58  ;;  %v4103_v40 = vpop.f32.mrb[62].mxu1 }
 0x1b3   : > { %v4104_v28 = vpop.f32.mrb[63].mxu1 }
 0x1b4   : > { %v1734_v47 = vadd.f32 %v4041_v0, %v5612_v36  ;;  %v4105_v3 = vadd.f32 %v4104_v28, %v4103_v40  ;;  %v1828_v20 = vadd.f32 %v4102_v42, %v1731_v37 }
 0x1b6   : > { %v4262_v8 = vpop.f32.mrb[64].mxu0  ;;  %v1831_v32 = vadd.f32 %v4105_v3, %v1734_v47 }
 0x1b7   : > { %v5655_v1 = vadd.f32 %v4262_v8, %v5622_v11  ;;  %v1868_v53 = vpop.f32.mrb[65].mxu0 }
 0x1b8   : > { %v5658_v41 = vadd.f32 %v1868_v53, %v5616_v27  ;;  %v4263_v60 = vpop.f32.mrb[66].mxu0  ;;  %v4138_v50 = vpop.f32.mrb[64].mxu1 }
 0x1b9   : > { %v5661_v31 = vadd.f32 %v4263_v60, %v5624_v16  ;;  %v1871_v43 = vpop.f32.mrb[67].mxu0  ;;  %v4139_v29 = vpop.f32.mrb[65].mxu1 }
 0x1ba   : > { %v5664_v36 = vadd.f32 %v1871_v43, %v5618_v45  ;;  %v4140_v10 = vadd.f32 %v4139_v29, %v4138_v50  ;;  %v4141_v57 = vpop.f32.mrb[66].mxu1 }
 0x1bb   : > { %v4142_v17 = vpop.f32.mrb[67].mxu1 }
 0x1bc   : > { %v4143_v23 = vadd.f32 %v4142_v17, %v4141_v57 }
 0x1be   : > { %v4266_v11 = vpop.f32.mrb[68].mxu0 }
 0x1bf   : > { %v5667_v18 = vadd.f32 %v4266_v11, %v5634_v55  ;;  %v1884_v27 = vpop.f32.mrb[69].mxu0 }
 0x1c0   : > { %v5670_v2 = vadd.f32 %v1884_v27, %v5628_v35  ;;  %v4267_v63 = vpop.f32.mrb[70].mxu0  ;;  %v4144_v16 = vpop.f32.mrb[68].mxu1 }
 0x1c1   : > { %v5673_v24 = vadd.f32 %v4267_v63, %v5636_v59  ;;  %v1887_v51 = vpop.f32.mrb[71].mxu0  ;;  %v4145_v45 = vpop.f32.mrb[69].mxu1 }
 0x1c2   : > { %v5676_v34 = vadd.f32 %v1887_v51, %v5630_v13  ;;  %v4146_v25 = vadd.f32 %v4145_v45, %v4144_v16  ;;  %v4147_v19 = vpop.f32.mrb[70].mxu1 }
 0x1c3   : > { %v4148_v46 = vpop.f32.mrb[71].mxu1 }
 0x1c4   : > { %v4149_v22 = vadd.f32 %v4148_v46, %v4147_v19  ;;  %v4676_v46 = vmov 1966171168  }
 0x1c6   : > { %v4270_v55 = vpop.f32.mrb[72].mxu0 }
 0x1c7   : > { %v5679_v14 = vadd.f32 %v4270_v55, %v5646_v7  ;;  %v1900_v35 = vpop.f32.mrb[73].mxu0  ;;  %v2948_v55 = vunpack.c.l.s4 %v4676_v46 }
 0x1c8   : > { %v5682_v4 = vadd.f32 %v1900_v35, %v5640_v30  ;;  %v4271_v48 = vpop.f32.mrb[74].mxu0 }
 0x1c9   : > { %v5685_v59 = vadd.f32 %v4271_v48, %v5648_v26  ;;  %v1903_v5 = vpop.f32.mrb[75].mxu0  ;;  %v3766_v26 = vld [vmem:[%s5903_s5] ss:$0 sm:$0xff]  ;;  %v2949_v48 = vunpack.c.0.s8 %v2948_v55 }
 0x1ca   : > { %v5688_v13 = vadd.f32 %v1903_v5, %v5642_v56  ;;  %v2732_v56 = vadd.f32 %v4140_v10, %v3766_v26  ;;  %v2740_v53 = vadd.f32 %v4146_v25, %v3766_v26  ;;  %v2743_v57 = vadd.f32 %v4149_v22, %v3766_v26 }
 0x1cb   : > { %v2950_v25 = vlaneseq }
 0x1cd   : > { %v2951_v5 = vshrl.u32 %v2950_v25, 7 }
 0x1ce   : > { %v4274_v49 = vpop.f32.mrb[76].mxu0 }
 0x1cf   : > { %v5690_v61 = vadd.f32 %v4274_v49, %v1828_v20  ;;  %v1916_v39 = vpop.f32.mrb[77].mxu0 }
 0x1d0   : > { %v5692_v21 = vadd.f32 %v1916_v39, %v1820_v9  ;;  %v4275_v7 = vpop.f32.mrb[78].mxu0  ;;  %v2735_v9 = vadd.f32 %v4143_v23, %v3766_v26 }
 0x1d1   : > { %v5694_v6 = vadd.f32 %v4275_v7, %v1831_v32  ;;  %v1919_v15 = vpop.f32.mrb[79].mxu0 }
 0x1d2   : > { %v5696_v30 = vadd.f32 %v1919_v15, %v1823_v33 }
 0x1d6   : > { %v4166_v44 = vpop.f32.mrb[80].mxu0 }
 0x1d7   : > { %v4167_v52 = vpop.f32.mrb[81].mxu0 }
 0x1d8   : > { %v4168_v12 = vadd.f32 %v4167_v52, %v4166_v44  ;;  %v4169_v38 = vpop.f32.mrb[82].mxu0  ;;  %v4194_v58 = vpop.f32.mrb[72].mxu1  ;;  %v4677_v44 = vmov 1983009808  }
 0x1d9   : > { %v4170_v54 = vpop.f32.mrb[83].mxu0  ;;  %v4195_v62 = vpop.f32.mrb[73].mxu1  ;;  %v3273_v52 = vunpack.c.l.s4 %v4677_v44 }
 0x1da   : > { %v2781_v37 = vadd.f32 %v4168_v12, %v2732_v56  ;;  %v4171_v0 = vadd.f32 %v4170_v54, %v4169_v38  ;;  %v4196_v42 = vadd.f32 %v4195_v62, %v4194_v58  ;;  %v4197_v40 = vpop.f32.mrb[74].mxu1  ;;  %v5707_v38 = vsub.s32 %v2949_v48, %v2951_v5 }
 0x1db   : > { %v4198_v28 = vpop.f32.mrb[75].mxu1 }
 0x1dc   : > { %v2784_v33 = vadd.f32 %v4171_v0, %v2735_v9  ;;  %v2830_v47 = vadd.f32 %v4196_v42, %v2781_v37  ;;  %v4199_v3 = vadd.f32 %v4198_v28, %v4197_v40  ;;  %v3274_v37 = vunpack.c.0.s8 %v3273_v52 }
 0x1de   : > { %v2833_v20 = vadd.f32 %v4199_v3, %v2784_v33  ;;  %v4172_v8 = vpop.f32.mrb[84].mxu0  ;;  %v5712_v33 = vsub.s32 0, %v2951_v5 }
 0x1df   : > { %v4173_v32 = vpop.f32.mrb[85].mxu0 }
 0x1e0   : > { %v4174_v60 = vadd.f32 %v4173_v32, %v4172_v8  ;;  %v4175_v50 = vpop.f32.mrb[86].mxu0  ;;  %v4200_v43 = vpop.f32.mrb[76].mxu1 }
 0x1e1   : > { %v4176_v29 = vpop.f32.mrb[87].mxu0  ;;  %v4201_v10 = vpop.f32.mrb[77].mxu1 }
 0x1e2   : > { %v2789_v17 = vadd.f32 %v4174_v60, %v2740_v53  ;;  %v4177_v23 = vadd.f32 %v4176_v29, %v4175_v50  ;;  %v4202_v11 = vadd.f32 %v4201_v10, %v4200_v43  ;;  %v4203_v27 = vpop.f32.mrb[78].mxu1  ;;  %v5718_v50 = vsub.s32 %v3274_v37, %v2951_v5 }
 0x1e3   : > { %v4204_v63 = vpop.f32.mrb[79].mxu1 }
 0x1e4   : > { %v2792_v16 = vadd.f32 %v4177_v23, %v2743_v57  ;;  %v5701_v51 = vadd.f32 %v4202_v11, %v2789_v17  ;;  %v4205_v45 = vadd.f32 %v4204_v63, %v4203_v27 }
 0x1e6   : > { %v5703_v19 = vadd.f32 %v4205_v45, %v2792_v16 }
 0x1f6   : > { %v4222_v35 = vpop.f32.mrb[88].mxu0 }
 0x1f7   : > { %v4223_v49 = vpop.f32.mrb[89].mxu0 }
 0x1f8   : > { %v4224_v39 = vadd.f32 %v4223_v49, %v4222_v35  ;;  %v4225_v22 = vpop.f32.mrb[90].mxu0  ;;  %v5705_v7 = vpop.f32.mrb[80].mxu1 }
 0x1f9   : > { %v4226_v15 = vpop.f32.mrb[91].mxu0  ;;  %v2927_v26 = vpop.f32.mrb[81].mxu1 }
 0x1fa   : > { %v4227_v56 = vadd.f32 %v4226_v15, %v4225_v22  ;;  %v2879_v12 = vadd.f32 %v4224_v39, %v2830_v47  ;;  %v5709_v58 = vpop.f32.mrb[82].mxu1 }
 0x1fb   : > { %v2930_v54 = vpop.f32.mrb[83].mxu1 }
 0x1fc   : > { %v2928_v62 = vadd.f32 %v2927_v26, %v2879_v12  ;;  %v2882_v9 = vadd.f32 %v4227_v56, %v2833_v20 }
 0x1fe   : > { %v2946_v0 = vcombine.high %v2928_v62, %v2928_v62  ;;  %v2953_v42 = vrot.slane %v2928_v62, %v5707_v38  ;;  %v2931_v40 = vadd.f32 %v2930_v54, %v2882_v9  ;;  %v4228_v28 = vpop.f32.mrb[92].mxu0 }
 0x1ff   : > { %v4229_v3 = vpop.f32.mrb[93].mxu0 }
 0x200   : > { %v2960_v8 = vrot.slane %v2946_v0, %v5707_v38  ;;  %v2961_v32 = vcombine.high %v2953_v42, %v2953_v42  ;;  %v2969_v47 = vrot.slane %v2953_v42, %v5707_v38  ;;  %v2995_v53 = vcombine.high %v2931_v40, %v2931_v40  ;;  %v5716_v60 = vpop.f32.mrb[94].mxu0 }
 0x201   : > { %v3002_v20 = vrot.slane %v2931_v40, %v5707_v38  ;;  %v4230_v43 = vadd.f32 %v4229_v3, %v4228_v28  ;;  %v5721_v29 = vpop.f32.mrb[95].mxu0 }
 0x202   : > { %v2962_v10 = vcombine.high %v2960_v8, %v2960_v8  ;;  %v2976_v57 = vrot.slane %v2960_v8, %v5707_v38  ;;  %v2983_v17 = vrot.slane %v2961_v32, %v5707_v38  ;;  %v2991_v23 = vcombine.high %v2969_v47, %v2969_v47 }
 0x203   : > { %v3145_v11 = vrot.slane %v2969_v47, %v5712_v33  ;;  %v3009_v27 = vrot.slane %v2995_v53, %v5707_v38  ;;  %v3010_v63 = vcombine.high %v3002_v20, %v3002_v20  ;;  %v3018_v16 = vrot.slane %v3002_v20, %v5707_v38 }
 0x204   : > { %v2990_v45 = vrot.slane %v2962_v10, %v5707_v38  ;;  %v2992_v46 = vcombine.high %v2976_v57, %v2976_v57  ;;  %v2993_v55 = vcombine.high %v2983_v17, %v2983_v17  ;;  %v3149_v25 = vrot.slane %v2983_v17, %v5712_v33 }
 0x205   : > { %v3153_v35 = vrot.slane %v2991_v23, %v5712_v33  ;;  %v3161_v48 = vrot.slane %v2976_v57, %v5712_v33  ;;  %v3011_v5 = vcombine.high %v3009_v27, %v3009_v27  ;;  %v3025_v49 = vrot.slane %v3009_v27, %v5707_v38 }
 0x206   : > { %v2994_v39 = vcombine.high %v2990_v45, %v2990_v45  ;;  %v3157_v22 = vrot.slane %v2993_v55, %v5712_v33  ;;  %v3165_v15 = vrot.slane %v2990_v45, %v5712_v33  ;;  %v3169_v26 = vrot.slane %v2992_v46, %v5712_v33 }
 0x207   : > { %v3270_v44 = vcombine.low %v3145_v11, %v3149_v25  ;;  %v3032_v52 = vrot.slane %v3010_v63, %v5707_v38  ;;  %v3039_v56 = vrot.slane %v3011_v5, %v5707_v38  ;;  %v3040_v12 = vcombine.high %v3018_v16, %v3018_v16 }
 0x208   : > { %v3173_v54 = vrot.slane %v2994_v39, %v5712_v33  ;;  %v3271_v62 = vcombine.low %v3153_v35, %v3157_v22  ;;  %v3287_v9 = vcombine.low %v3161_v48, %v3165_v15  ;;  %v3041_v37 = vcombine.high %v3025_v49, %v3025_v49 }
 0x209   : > { %v3278_v0 = vrot.slane %v3270_v44, %v5718_v50  ;;  %v3042_v42 = vcombine.high %v3032_v52, %v3032_v52  ;;  %v3043_v40 = vcombine.high %v3039_v56, %v3039_v56  ;;  %v3177_v28 = vrot.slane %v3018_v16, %v5712_v33 }
 0x20a   : > { %v3285_v3 = vrot.slane %v3271_v62, %v5718_v50  ;;  %v3288_v8 = vcombine.low %v3169_v26, %v3173_v54  ;;  %v3295_v32 = vrot.slane %v3287_v9, %v5718_v50  ;;  %v3181_v47 = vrot.slane %v3032_v52, %v5712_v33 }
 0x20b   : > { %v3185_v53 = vrot.slane %v3040_v12, %v5712_v33  ;;  %v3189_v20 = vrot.slane %v3042_v42, %v5712_v33  ;;  %v3193_v10 = vrot.slane %v3025_v49, %v5712_v33  ;;  %v3197_v57 = vrot.slane %v3039_v56, %v5712_v33 }
 0x20c   : > { %v3286_v17 = vcombine.low %v3278_v0, %v3285_v3  ;;  %v3302_v23 = vrot.slane %v3288_v8, %v5718_v50  ;;  %v3201_v11 = vrot.slane %v3041_v37, %v5712_v33  ;;  %v3205_v27 = vrot.slane %v3043_v40, %v5712_v33 }
 0x20d   : > { %v3304_v63 = vcombine.low %v3177_v28, %v3181_v47  ;;  %v3305_v16 = vcombine.low %v3185_v53, %v3189_v20  ;;  %v3321_v45 = vcombine.low %v3193_v10, %v3197_v57  ;;  %v2887_v46 = vadd.f32 %v4230_v43, %v5701_v51 }
 0x20e   : > { %v3303_v55 = vcombine.low %v3295_v32, %v3302_v23  ;;  %v3414_v25 = vadd.f32 %v3286_v17, %v5658_v41  ;;  %v3416_v35 = vadd.f32 %v3286_v17, %v5655_v1  ;;  %v3322_v48 = vcombine.low %v3201_v11, %v3205_v27 }
 0x20f   : > { %v3312_v5 = vrot.slane %v3304_v63, %v5718_v50  ;;  %v3319_v49 = vrot.slane %v3305_v16, %v5718_v50  ;;  %v3329_v39 = vrot.slane %v3321_v45, %v5718_v50  ;;  %v2936_v22 = vadd.f32 %v5705_v7, %v2887_v46 }
 0x210   : > { %v3415_v15 = vadd.f32 %v3303_v55, %v5664_v36  ;;  %v3417_v26 = vadd.f32 %v3303_v55, %v5661_v31  ;;  %3430 = vst [vmem:[%s5763_s4] sm:$0xff] %v3414_v25  ;;  %3432 = vst [vmem:[%s5763_s4 + $0x10] sm:$0xff] %v3416_v35  ;;  %v3336_v1 = vrot.slane %v3322_v48, %v5718_v50 }
 0x211   : > { %v4233_v41 = vadd.f32 %v5721_v29, %v5716_v60  ;;  %v3320_v51 = vcombine.low %v3312_v5, %v3319_v49  ;;  %v3044_v7 = vcombine.high %v2936_v22, %v2936_v22  ;;  %v3051_v36 = vrot.slane %v2936_v22, %v5707_v38 }
 0x212   : > { %3431 = vst [vmem:[%s5763_s4 + $0x8] sm:$0xff] %v3415_v15  ;;  %3433 = vst [vmem:[%s5763_s4 + $0x18] sm:$0xff] %v3417_v26  ;;  %v3337_v31 = vcombine.low %v3329_v39, %v3336_v1 }
 0x213   : > { %v2890_v43 = vadd.f32 %v4233_v41, %v5703_v19  ;;  %v3418_v44 = vadd.f32 %v3320_v51, %v5670_v2  ;;  %v3420_v52 = vadd.f32 %v3320_v51, %v5667_v18  ;;  %v3058_v56 = vrot.slane %v3044_v7, %v5707_v38 }
 0x214   : > { %v3059_v60 = vcombine.high %v3051_v36, %v3051_v36  ;;  %v3419_v29 = vadd.f32 %v3337_v31, %v5676_v34  ;;  %v3421_v12 = vadd.f32 %v3337_v31, %v5673_v24  ;;  %v3067_v54 = vrot.slane %v3051_v36, %v5707_v38 }
 0x215   : > { %v2939_v62 = vadd.f32 %v5709_v58, %v2890_v43  ;;  %3434 = vst [vmem:[%s5763_s4 + $0x20] sm:$0xff] %v3418_v44  ;;  %3436 = vst [vmem:[%s5763_s4 + $0x30] sm:$0xff] %v3420_v52  ;;  %v3060_v9 = vcombine.high %v3058_v56, %v3058_v56  ;;  %v3074_v19 = vrot.slane %v3058_v56, %v5707_v38 }
 0x216   : > { %v3081_v2 = vrot.slane %v3059_v60, %v5707_v38  ;;  %3435 = vst [vmem:[%s5763_s4 + $0x28] sm:$0xff] %v3419_v29  ;;  %3437 = vst [vmem:[%s5763_s4 + $0x38] sm:$0xff] %v3421_v12  ;;  %v3089_v18 = vcombine.high %v3067_v54, %v3067_v54  ;;  %v3209_v37 = vrot.slane %v3067_v54, %v5712_v33 }
 0x217   : > { %v3093_v0 = vcombine.high %v2939_v62, %v2939_v62  ;;  %v3100_v34 = vrot.slane %v2939_v62, %v5707_v38  ;;  %v3088_v24 = vrot.slane %v3060_v9, %v5707_v38  ;;  %v3090_v42 = vcombine.high %v3074_v19, %v3074_v19 }
 0x218   : > { %v3091_v40 = vcombine.high %v3081_v2, %v3081_v2  ;;  %v3213_v58 = vrot.slane %v3081_v2, %v5712_v33  ;;  %v3217_v28 = vrot.slane %v3089_v18, %v5712_v33  ;;  %v3225_v3 = vrot.slane %v3074_v19, %v5712_v33 }
 0x219   : > { %v3107_v8 = vrot.slane %v3093_v0, %v5707_v38  ;;  %v3108_v32 = vcombine.high %v3100_v34, %v3100_v34  ;;  %v3092_v47 = vcombine.high %v3088_v24, %v3088_v24  ;;  %v3229_v20 = vrot.slane %v3088_v24, %v5712_v33 }
 0x21a   : > { %v3221_v53 = vrot.slane %v3091_v40, %v5712_v33  ;;  %v3233_v10 = vrot.slane %v3090_v42, %v5712_v33  ;;  %v3338_v57 = vcombine.low %v3209_v37, %v3213_v58  ;;  %v3116_v23 = vrot.slane %v3100_v34, %v5707_v38 }
 0x21b   : > { %v3109_v17 = vcombine.high %v3107_v8, %v3107_v8  ;;  %v3123_v11 = vrot.slane %v3107_v8, %v5707_v38  ;;  %v3237_v27 = vrot.slane %v3092_v47, %v5712_v33  ;;  %v3355_v16 = vcombine.low %v3225_v3, %v3229_v20 }
 0x21c   : > { %v3339_v63 = vcombine.low %v3217_v28, %v3221_v53  ;;  %v3130_v45 = vrot.slane %v3108_v32, %v5707_v38  ;;  %v3346_v46 = vrot.slane %v3338_v57, %v5718_v50  ;;  %v3138_v25 = vcombine.high %v3116_v23, %v3116_v23 }
 0x21d   : > { %v3137_v55 = vrot.slane %v3109_v17, %v5707_v38  ;;  %v3139_v35 = vcombine.high %v3123_v11, %v3123_v11  ;;  %v3356_v5 = vcombine.low %v3233_v10, %v3237_v27  ;;  %v3363_v49 = vrot.slane %v3355_v16, %v5718_v50 }
 0x21e   : > { %v3353_v48 = vrot.slane %v3339_v63, %v5718_v50  ;;  %v3140_v39 = vcombine.high %v3130_v45, %v3130_v45  ;;  %v3241_v15 = vrot.slane %v3116_v23, %v5712_v33  ;;  %v3245_v26 = vrot.slane %v3130_v45, %v5712_v33 }
 0x21f   : > { %v3141_v22 = vcombine.high %v3137_v55, %v3137_v55  ;;  %v3249_v1 = vrot.slane %v3138_v25, %v5712_v33  ;;  %v3370_v38 = vrot.slane %v3356_v5, %v5718_v50  ;;  %v3257_v7 = vrot.slane %v3123_v11, %v5712_v33 }
 0x220   : > { %v3354_v41 = vcombine.low %v3346_v46, %v3353_v48  ;;  %v3253_v51 = vrot.slane %v3140_v39, %v5712_v33  ;;  %v3261_v36 = vrot.slane %v3137_v55, %v5712_v33  ;;  %v3265_v31 = vrot.slane %v3139_v35, %v5712_v33 }
 0x221   : > { %v3269_v43 = vrot.slane %v3141_v22, %v5712_v33  ;;  %v3372_v44 = vcombine.low %v3241_v15, %v3245_v26  ;;  %v3371_v52 = vcombine.low %v3363_v49, %v3370_v38 }
 0x222   : > { %v3422_v56 = vadd.f32 %v3354_v41, %v5682_v4  ;;  %v3424_v60 = vadd.f32 %v3354_v41, %v5679_v14  ;;  %v3373_v29 = vcombine.low %v3249_v1, %v3253_v51  ;;  %v3389_v12 = vcombine.low %v3257_v7, %v3261_v36 }
 0x223   : > { %v3390_v54 = vcombine.low %v3265_v31, %v3269_v43  ;;  %v3423_v62 = vadd.f32 %v3371_v52, %v5688_v13  ;;  %v3425_v9 = vadd.f32 %v3371_v52, %v5685_v59  ;;  %v3380_v33 = vrot.slane %v3372_v44, %v5718_v50 }
 0x224   : > { %3438 = vst [vmem:[%s5763_s4 + $0x40] sm:$0xff] %v3422_v56  ;;  %3440 = vst [vmem:[%s5763_s4 + $0x50] sm:$0xff] %v3424_v60  ;;  %v3387_v19 = vrot.slane %v3373_v29, %v5718_v50  ;;  %v3397_v4 = vrot.slane %v3389_v12, %v5718_v50 }
 0x225   : > { %v3404_v14 = vrot.slane %v3390_v54, %v5718_v50  ;;  %3439 = vst [vmem:[%s5763_s4 + $0x48] sm:$0xff] %v3423_v62  ;;  %3441 = vst [vmem:[%s5763_s4 + $0x58] sm:$0xff] %v3425_v9 }
 0x226   : > { %v3388_v59 = vcombine.low %v3380_v33, %v3387_v19 }
 0x227   : > { %v3405_v13 = vcombine.low %v3397_v4, %v3404_v14 }
 0x228   : > { %v3426_v2 = vadd.f32 %v3388_v59, %v5692_v21  ;;  %v3428_v18 = vadd.f32 %v3388_v59, %v5690_v61 }
 0x229   : > { %v3427_v50 = vadd.f32 %v3405_v13, %v5696_v30  ;;  %v3429_v37 = vadd.f32 %v3405_v13, %v5694_v6 }
 0x22a   : > { %3442 = vst [vmem:[%s5763_s4 + $0x60] sm:$0xff] %v3426_v2  ;;  %3444 = vst [vmem:[%s5763_s4 + $0x70] sm:$0xff] %v3428_v18 }
 0x22b   : > { %3443 = vst [vmem:[%s5763_s4 + $0x68] sm:$0xff] %v3427_v50  ;;  %3445 = vst [vmem:[%s5763_s4 + $0x78] sm:$0xff] %v3429_v37 }
 0x22c   : > { %4586 = shalt.err (!%p4583_p7)
}
 0x22d   : > { %s4587_s18 = scalar_lea.hbm %s5834_s16, 2048  ;;  %s4591_s7 = scalar_lea.hbm %s5904_s6, 8192 }
 0x22e   : > { %p4588_p9 = scmp.ne.s32.totalorder %s5834_s16, %s4587_s18  ;;  %p4592_p1 = scmp.lt.u32.totalorder %s5834_s16, %s5904_s6 }
 0x22f   : > { %p4593_p4 = scmp.lt.u32.totalorder %s4591_s7, %s4587_s18  ;;  %p4595_p8 = scmp.lt.u32.totalorder %s4587_s18, %s5834_s16 }
 0x230   : > { %p4589_p11 = pnand %p4588_p9, %p5926_p10 }
 0x231   : > { %p4594_p3 = por %p4593_p4, %p4592_p1 }
 0x232   : > { %p4590_p13 = pneg %p4589_p11 }
 0x233   : > { %p4596_p12 = por %p4595_p8, %p4594_p3 }
 0x235   : > { %p4597_p0 = pnand %p4596_p12, %p4590_p13 }
 0x237   : > { %4600 = shalt.err (!%p4597_p0)
}
 0x238   : > { %s4679_s25 = smov 128   ;;  %s4680_s8 = smov 8  }
 0x239   : > { %4302 = dma.vmem_to_hbm [thread:$0]  (%p5926_p10), %s5836_s30, 2048, %s5834_s16, %s5846_s13, %s4679_s25, %s4679_s25, %s4680_s8  }
 0x23a PF: > { %p4314_p2 = scmp.ge.s32.totalorder %s4671_s28, 2  ;;  %s3479_s19 = sand.u32 1, %s4643_s21  }
 0x23b   : > { %p5927_p5 = scmp.ne.s32.totalorder %s5915_s12, 0  ;;  %s3480_s15 = scalar_lea.sflag [#allocation4], %s3479_s19 }
 0x23d   : > { %p4309_p6 = pnand %p4314_p2, %p5927_p5 }
 0x23f   : > { %4638 = dma.done.wait (!%p4309_p6), %s3480_s15, 2048  }
 0x240   : > { %4640 = vsyncadd (!%p4309_p6), %s3480_s15, 4294965248  ;;  %s20_s28 = sadd.s32 1, %s4671_s28   ;;  %s5928_s11 = sld [smem:[#allocation8_spill]] }
 0x241   : > { %p17_p7 = scmp.ge.s32.totalorder %s20_s28, 6   ;;  %s5929_s30 = sld [smem:[#allocation9_spill]] }
 0x242   : > { %s5930_s21 = smov %s4647_s22  ;;  %s5931_s22 = smov %s4651_s23 }
 0x243   : > { %s5932_s23 = smov %s4795_s17  ;;  %s5933_s24 = smov %s4663_s26 }
 0x244   : > { %s5934_s25 = smov %s4667_s27  ;;  %19 = sbr.rel (!%p17_p7) target bundleno = 8 (0x8), region = 99 }
 0x246   : > { %s5935_s26 = smov %s5928_s11 }
 0x247   : > { %s5936_s27 = smov %s5929_s30 }
 0x24b   :  { %3485 = vsyncpa [#allocation3], 1 }
 0x24c   :  { %3487 = vsyncpa [#allocation3 + $0x1], 1 }
 0x24d   :  { %3488 = vsyncpa [#allocation4], 1 }
 0x24e   :  { %3490 = vsyncpa [#allocation4 + $0x1], 1 }

</bundles_post_ra>
